<compile_context>
chip_gen: v6e
topology: v6e:2x2x1
jax: 0.10.0
libtpu: 0.0.40
codegen_flags: <defaults>
</compile_context>

<pallas_src>
import functools

import jax
import jax.numpy as jnp
from jax.experimental import pallas as pl
from jax.experimental.pallas import tpu as pltpu


def _round_up(n, m):
    return ((n + m - 1) // m) * m


def _sigmoid(x):
    # sigmoid(x) == 0.5 * tanh(0.5 * x) + 0.5  -> single EUP tanh per gate.
    return 0.5 * jnp.tanh(0.5 * x) + 0.5


# --------------------------------------------------------------------------------------
# Fused kernel: per-chunk input projection + serial recurrence + final Linear on h_T.
# Grid: (batch_blocks [parallel], time_chunks [arbitrary]).
# --------------------------------------------------------------------------------------
def _lstm_fused_kernel(x_ref, wih_ref, bias_ref, whh_ref, wlin_ref, blin_ref, out_ref,
                       h_ref, c_ref, *, hp, tc, t_real, mask_tail):
    t_blk = pl.program_id(1)

    @pl.when(t_blk == 0)
    def _init():
        h_ref[...] = jnp.zeros_like(h_ref)
        c_ref[...] = jnp.zeros_like(c_ref)

    tcb, bp, i_sz = x_ref.shape
    g = 4 * hp

    # ---- Chunk input projection: off the serial h-dependence, one big MXU matmul. ----
    x2 = x_ref[...].reshape(tcb * bp, i_sz)                              # bf16 (tc*Bb, I)
    xp = jnp.dot(x2, wih_ref[...], preferred_element_type=jnp.float32)   # (tc*Bb, 4Hp) f32
    xp = (xp + bias_ref[...]).reshape(tcb, bp, g)

    h = h_ref[...]                                                       # (Bb, Hp) f32
    c = c_ref[...]

    # ---- Serial recurrence, statically unrolled across the chunk. --------------------
    for tt in range(tc):
        hb = h.astype(jnp.bfloat16)
        # Per-gate matmuls read lane-aligned W_hh slices from VMEM inside the loop
        # (3 vld slots/cycle make the reload essentially free) instead of holding the
        # full (Hp, 4Hp) weight in vregs across the unrolled loop.
        i_pre = xp[tt, :, 0 * hp:1 * hp] + jnp.dot(
            hb, whh_ref[:, 0 * hp:1 * hp], preferred_element_type=jnp.float32)
        f_pre = xp[tt, :, 1 * hp:2 * hp] + jnp.dot(
            hb, whh_ref[:, 1 * hp:2 * hp], preferred_element_type=jnp.float32)
        g_pre = xp[tt, :, 2 * hp:3 * hp] + jnp.dot(
            hb, whh_ref[:, 2 * hp:3 * hp], preferred_element_type=jnp.float32)
        o_pre = xp[tt, :, 3 * hp:4 * hp] + jnp.dot(
            hb, whh_ref[:, 3 * hp:4 * hp], preferred_element_type=jnp.float32)
        i_g = _sigmoid(i_pre)
        f_g = _sigmoid(f_pre)
        g_g = jnp.tanh(g_pre)
        o_g = _sigmoid(o_pre)
        c_new = f_g * c + i_g * g_g
        h_new = o_g * jnp.tanh(c_new)
        if mask_tail:
            # Padded tail timesteps (t >= t_real) must not update the state.
            m = ((t_blk * tc + tt) < t_real).astype(jnp.float32)
            c = c + m * (c_new - c)
            h = h + m * (h_new - h)
        else:
            c, h = c_new, h_new

    h_ref[...] = h
    c_ref[...] = c

    # ---- Final Linear on h_T, fused into the last time chunk. ------------------------
    @pl.when(t_blk == pl.num_programs(1) - 1)
    def _finalize():
        out_ref[...] = (jnp.dot(h.astype(jnp.bfloat16), wlin_ref[...],
                                preferred_element_type=jnp.float32)
                        + blin_ref[...])


# --------------------------------------------------------------------------------------
# Wrapper: parameter layout / padding (plain JAX glue, one-time & tiny) + pallas_call.
# --------------------------------------------------------------------------------------
def lstm_model_forward(x, params):
    """x: (B, T, input_size) f32.  Returns (B, output_size) f32."""
    w_ih, w_hh, b_ih, b_hh, w_lin, b_lin = params
    B, T, I = x.shape
    H = w_hh.shape[1]
    O = w_lin.shape[0]

    f32, bf16 = jnp.float32, jnp.bfloat16

    Hp = _round_up(H, 128)            # lane-aligned gate blocks
    Op = _round_up(O, 128)            # lane-dense output store
    Bp = _round_up(max(B, 8), 8)      # sublane-aligned batch
    G = 4 * Hp

    # Batch-block axis: shard independent per-sample recurrences across TensorCores
    # (v7x has 2 TCs/chip).  Each block gets its own h/c scratch (re-init at t_blk==0).
    if Bp >= 16 and Bp % 16 == 0:
        Bb = Bp // 2
    else:
        Bb = Bp
    nb = Bp // Bb
    # TODO(synk): allow >2 batch blocks / per-generation core counts once profiled.

    # Time-chunk sizing from a conservative cross-generation VMEM budget
    # (v7x: 64 MiB physical VMEM per TC; v5e/v6e: 128 MiB).
    budget = 32 * 1024 * 1024
    per_step = Bb * (2 * I * 2 + G * 4 + G * 2)   # x dbuf (bf16) + xp (f32) + gate slack
    tc = int(max(1, min(T, 16, budget // max(per_step, 1))))
    T_pad = _round_up(T, tc)
    nt = T_pad // tc
    mask_tail = (T_pad != T)

    # VMEM limit from the actual footprint (double-buffered inputs counted), capped so
    # it is safe on v7x's 64 MiB VMEM.
    footprint = (
        2 * tc * Bb * I * 2 +     # streamed x chunk, double-buffered bf16
        2 * I * G * 2 +           # W_ih bf16
        2 * G * 4 +               # gate bias f32
        2 * Hp * G * 2 +          # W_hh bf16
        2 * Hp * Op * 2 +         # W_lin bf16
        2 * Op * 4 +              # b_lin f32
        2 * Bb * Op * 4 +         # output block f32
        2 * Bb * Hp * 4 +         # h, c scratch f32
        tc * Bb * G * 4 +         # per-chunk projection intermediate f32
        16 * Bb * Hp * 4          # gate temporaries / scheduling headroom
    )
    vmem_lim = int(min(max(2 * footprint, 16 * 1024 * 1024), 48 * 1024 * 1024))

    def pad_gate_cols(w):             # (rows, 4H) -> (rows, 4Hp), per-gate zero padding
        r = w.shape[0]
        w4 = jnp.pad(w.reshape(r, 4, H), ((0, 0), (0, 0), (0, Hp - H)))
        return w4.reshape(r, G)

    wih_p = pad_gate_cols(w_ih.T.astype(f32)).astype(bf16)                          # (I, 4Hp)
    whh_p = jnp.pad(pad_gate_cols(w_hh.T.astype(f32)),
                    ((0, Hp - H), (0, 0))).astype(bf16)                             # (Hp, 4Hp)
    bias_p = pad_gate_cols((b_ih + b_hh).astype(f32).reshape(1, 4 * H))             # (1, 4Hp) f32
    wlin_p = jnp.pad(w_lin.T.astype(f32), ((0, Hp - H), (0, Op - O))).astype(bf16)  # (Hp, Op)
    blin_p = jnp.pad(b_lin.astype(f32).reshape(1, O), ((0, 0), (0, Op - O)))        # (1, Op) f32

    # Time-major, batch/time-padded, bf16 input (single fused XLA transpose+pad+cast).
    # TODO(synk): fold this transpose into the kernel (in-VMEM (b,t) swap) once that
    # relayout is verified to lower on all target TPU generations.
    x_tm = jnp.transpose(x.astype(f32), (1, 0, 2))
    x_tm = jnp.pad(x_tm, ((0, T_pad - T), (0, Bp - B), (0, 0))).astype(bf16)        # (T_pad, Bp, I)

    kernel = functools.partial(_lstm_fused_kernel, hp=Hp, tc=tc,
                               t_real=T, mask_tail=mask_tail)

    out_p = pl.pallas_call(
        kernel,
        out_shape=jax.ShapeDtypeStruct((Bp, Op), f32),
        grid=(nb, nt),
        in_specs=[
            pl.BlockSpec((tc, Bb, I), lambda bi, ti: (ti, bi, 0)),   # streamed x chunk
            pl.BlockSpec((I, G), lambda bi, ti: (0, 0)),             # W_ih (resident)
            pl.BlockSpec((1, G), lambda bi, ti: (0, 0)),             # gate bias
            pl.BlockSpec((Hp, G), lambda bi, ti: (0, 0)),            # W_hh (resident)
            pl.BlockSpec((Hp, Op), lambda bi, ti: (0, 0)),           # W_lin (resident)
            pl.BlockSpec((1, Op), lambda bi, ti: (0, 0)),            # b_lin
        ],
        out_specs=pl.BlockSpec((Bb, Op), lambda bi, ti: (bi, 0)),
        scratch_shapes=[pltpu.VMEM((Bb, Hp), f32),                   # h
                        pltpu.VMEM((Bb, Hp), f32)],                  # c
        compiler_params=pltpu.CompilerParams(
            dimension_semantics=("parallel", "arbitrary"),
            vmem_limit_bytes=vmem_lim),
    )(x_tm, wih_p, bias_p, whh_p, wlin_p, blin_p)

    return out_p[:B, :O]


# --------------------------------------------------------------------------------------
# Init + pure-JAX reference (mirrors torch.nn.LSTM(batch_first=True) + Linear).
# --------------------------------------------------------------------------------------
def init_params(key, input_size, hidden_size, output_size):
    ks = jax.random.split(key, 6)
    bound = 1.0 / jnp.sqrt(hidden_size)
    w_ih = jax.random.uniform(ks[0], (4 * hidden_size, input_size), jnp.float32, -bound, bound)
    w_hh = jax.random.uniform(ks[1], (4 * hidden_size, hidden_size), jnp.float32, -bound, bound)
    b_ih = jax.random.uniform(ks[2], (4 * hidden_size,), jnp.float32, -bound, bound)
    b_hh = jax.random.uniform(ks[3], (4 * hidden_size,), jnp.float32, -bound, bound)
    w_lin = jax.random.uniform(ks[4], (output_size, hidden_size), jnp.float32, -bound, bound)
    b_lin = jax.random.uniform(ks[5], (output_size,), jnp.float32, -bound, bound)
    return (w_ih, w_hh, b_ih, b_hh, w_lin, b_lin)


def _reference_forward(x, params):
    w_ih, w_hh, b_ih, b_hh, w_lin, b_lin = params
    B, T, _ = x.shape
    H = w_hh.shape[1]
    h = jnp.zeros((B, H), jnp.float32)
    c = jnp.zeros((B, H), jnp.float32)
    for t in range(T):
        gates = x[:, t, :] @ w_ih.T + h @ w_hh.T + b_ih + b_hh
        i_g = jax.nn.sigmoid(gates[:, 0 * H:1 * H])
        f_g = jax.nn.sigmoid(gates[:, 1 * H:2 * H])
        g_g = jnp.tanh(gates[:, 2 * H:3 * H])
        o_g = jax.nn.sigmoid(gates[:, 3 * H:4 * H])
        c = f_g * c + i_g * g_g
        h = o_g * jnp.tanh(c)
    return h @ w_lin.T + b_lin


if __name__ == "__main__":
    INPUT_SIZE, HIDDEN_SIZE, OUTPUT_SIZE = 8, 32, 4

    key = jax.random.PRNGKey(0)
    k_x1, k_x2, k_p = jax.random.split(key, 3)
    params = init_params(k_p, INPUT_SIZE, HIDDEN_SIZE, OUTPUT_SIZE)

    # Case 1: small T that divides the time chunk exactly.
    x1 = jax.random.normal(k_x1, (2, 8, INPUT_SIZE), jnp.float32)
    out1 = jax.block_until_ready(lstm_model_forward(x1, params))
    ref1 = _reference_forward(x1, params)
    assert out1.shape == (2, OUTPUT_SIZE)
    err1 = float(jnp.max(jnp.abs(out1 - ref1)))
    assert err1 < 5e-2, f"mismatch vs reference, case 1 (max abs err {err1})"

    # Case 2: T not divisible by the chunk -> exercises padded-tail timestep masking.
    x2 = jax.random.normal(k_x2, (2, 19, INPUT_SIZE), jnp.float32)
    out2 = jax.block_until_ready(lstm_model_forward(x2, params))
    ref2 = _reference_forward(x2, params)
    assert out2.shape == (2, OUTPUT_SIZE)
    err2 = float(jnp.max(jnp.abs(out2 - ref2)))
    assert err2 < 5e-2, f"mismatch vs reference, case 2 (max abs err {err2})"

    print("KERNEL_OK")
</pallas_src>

<mosaic_0001>
module attributes {stable_mosaic.version = 11 : i64} {
  func.func @_lstm_fused_kernel(%arg0: i32, %arg1: i32, %arg2: memref<8x8x8xbf16, #tpu.memory_space<vmem>>, %arg3: memref<8x512xbf16, #tpu.memory_space<vmem>>, %arg4: memref<1x512xf32, #tpu.memory_space<vmem>>, %arg5: memref<128x512xbf16, #tpu.memory_space<vmem>>, %arg6: memref<128x128xbf16, #tpu.memory_space<vmem>>, %arg7: memref<1x128xf32, #tpu.memory_space<vmem>>, %arg8: memref<8x128xf32, #tpu.memory_space<vmem>>, %arg9: memref<8x128xf32, #tpu.memory_space<vmem>>, %arg10: memref<8x128xf32, #tpu.memory_space<vmem>>) attributes {dimension_semantics = [#tpu.dimension_semantics<parallel>, #tpu.dimension_semantics<arbitrary>], iteration_bounds = array<i64: 1, 1>, scalar_prefetch = 0 : i64, scratch_operands = 2 : i64, tpu.core_type = #tpu.core_type<tc>, window_params = [{transform_indices = @transform_0, window_bounds = array<i64: 8, 8, 8>}, {pipeline_mode = #tpu.pipeline_mode<synchronous>, transform_indices = @transform_1, window_bounds = array<i64: 8, 512>}, {pipeline_mode = #tpu.pipeline_mode<synchronous>, transform_indices = @transform_2, window_bounds = array<i64: 1, 512>}, {pipeline_mode = #tpu.pipeline_mode<synchronous>, transform_indices = @transform_3, window_bounds = array<i64: 128, 512>}, {pipeline_mode = #tpu.pipeline_mode<synchronous>, transform_indices = @transform_4, window_bounds = array<i64: 128, 128>}, {pipeline_mode = #tpu.pipeline_mode<synchronous>, transform_indices = @transform_5, window_bounds = array<i64: 1, 128>}, {transform_indices = @transform_6, window_bounds = array<i64: 8, 128>}]} {
    %c0_i32 = arith.constant 0 : i32
    %0 = arith.cmpi eq, %arg1, %c0_i32 : i32
    %1 = arith.extui %0 : i1 to i32
    %c0_i32_0 = arith.constant 0 : i32
    %2 = arith.cmpi ne, %1, %c0_i32_0 : i32
    scf.if %2 {
      %cst_182 = arith.constant 0.000000e+00 : f32
      %402 = vector.broadcast %cst_182 : f32 to vector<8x128xf32>
      %c0_183 = arith.constant 0 : index
      %c0_184 = arith.constant 0 : index
      %403 = vector.load %arg9[%c0_183, %c0_184] : memref<8x128xf32, #tpu.memory_space<vmem>>, vector<8x128xf32>
      tpu.vector_store %arg9[%c0_183, %c0_184], %402 {strides = array<i32>} : memref<8x128xf32, #tpu.memory_space<vmem>>, vector<8x128xf32>,
      %cst_185 = arith.constant 0.000000e+00 : f32
      %404 = vector.broadcast %cst_185 : f32 to vector<8x128xf32>
      %c0_186 = arith.constant 0 : index
      %c0_187 = arith.constant 0 : index
      %405 = vector.load %arg10[%c0_186, %c0_187] : memref<8x128xf32, #tpu.memory_space<vmem>>, vector<8x128xf32>
      tpu.vector_store %arg10[%c0_186, %c0_187], %404 {strides = array<i32>} : memref<8x128xf32, #tpu.memory_space<vmem>>, vector<8x128xf32>,
    } else {
    }
    %c0 = arith.constant 0 : index
    %c0_1 = arith.constant 0 : index
    %c0_2 = arith.constant 0 : index
    %3 = vector.load %arg2[%c0, %c0_1, %c0_2] : memref<8x8x8xbf16, #tpu.memory_space<vmem>>, vector<8x8x8xbf16>
    %4 = vector.shape_cast %3 : vector<8x8x8xbf16> to vector<64x8xbf16>
    %c0_3 = arith.constant 0 : index
    %c0_4 = arith.constant 0 : index
    %5 = vector.load %arg3[%c0_3, %c0_4] : memref<8x512xbf16, #tpu.memory_space<vmem>>, vector<8x512xbf16>
    %cst = arith.constant dense<0.000000e+00> : vector<64x512xf32>
    %6 = tpu.matmul %4, %5, %cst {dimension_numbers = #tpu.dot_dimension_numbers<[1], [0], [0], [1], [0, 0, 1, 1], [], []>} : vector<64x8xbf16>, vector<8x512xbf16>, vector<64x512xf32> -> vector<64x512xf32>
    %c0_5 = arith.constant 0 : index
    %c0_6 = arith.constant 0 : index
    %7 = vector.load %arg4[%c0_5, %c0_6] : memref<1x512xf32, #tpu.memory_space<vmem>>, vector<1x512xf32>
    %8 = vector.broadcast %7 : vector<1x512xf32> to vector<64x512xf32>
    %9 = arith.addf %6, %8 : vector<64x512xf32>
    %10 = vector.shape_cast %9 : vector<64x512xf32> to vector<8x8x512xf32>
    %c0_7 = arith.constant 0 : index
    %c0_8 = arith.constant 0 : index
    %11 = vector.load %arg9[%c0_7, %c0_8] : memref<8x128xf32, #tpu.memory_space<vmem>>, vector<8x128xf32>
    %c0_9 = arith.constant 0 : index
    %c0_10 = arith.constant 0 : index
    %12 = vector.load %arg10[%c0_9, %c0_10] : memref<8x128xf32, #tpu.memory_space<vmem>>, vector<8x128xf32>
    %13 = arith.truncf %11 : vector<8x128xf32> to vector<8x128xbf16>
    %14 = vector.extract_strided_slice %10 {offsets = [0, 0, 0], sizes = [1, 8, 128], strides = [1, 1, 1]} : vector<8x8x512xf32> to vector<1x8x128xf32>
    %15 = vector.shape_cast %14 : vector<1x8x128xf32> to vector<8x128xf32>
    %c0_11 = arith.constant 0 : index
    %c0_12 = arith.constant 0 : index
    %16 = vector.load %arg5[%c0_11, %c0_12] : memref<128x512xbf16, #tpu.memory_space<vmem>>, vector<128x128xbf16>
    %cst_13 = arith.constant dense<0.000000e+00> : vector<8x128xf32>
    %17 = tpu.matmul %13, %16, %cst_13 {dimension_numbers = #tpu.dot_dimension_numbers<[1], [0], [0], [1], [0, 0, 1, 1], [], []>} : vector<8x128xbf16>, vector<128x128xbf16>, vector<8x128xf32> -> vector<8x128xf32>
    %18 = arith.addf %15, %17 : vector<8x128xf32>
    %19 = vector.extract_strided_slice %10 {offsets = [0, 0, 128], sizes = [1, 8, 128], strides = [1, 1, 1]} : vector<8x8x512xf32> to vector<1x8x128xf32>
    %20 = vector.shape_cast %19 : vector<1x8x128xf32> to vector<8x128xf32>
    %c0_14 = arith.constant 0 : index
    %c128 = arith.constant 128 : index
    %21 = vector.load %arg5[%c0_14, %c128] : memref<128x512xbf16, #tpu.memory_space<vmem>>, vector<128x128xbf16>
    %cst_15 = arith.constant dense<0.000000e+00> : vector<8x128xf32>
    %22 = tpu.matmul %13, %21, %cst_15 {dimension_numbers = #tpu.dot_dimension_numbers<[1], [0], [0], [1], [0, 0, 1, 1], [], []>} : vector<8x128xbf16>, vector<128x128xbf16>, vector<8x128xf32> -> vector<8x128xf32>
    %23 = arith.addf %20, %22 : vector<8x128xf32>
    %24 = vector.extract_strided_slice %10 {offsets = [0, 0, 256], sizes = [1, 8, 128], strides = [1, 1, 1]} : vector<8x8x512xf32> to vector<1x8x128xf32>
    %25 = vector.shape_cast %24 : vector<1x8x128xf32> to vector<8x128xf32>
    %c0_16 = arith.constant 0 : index
    %c256 = arith.constant 256 : index
    %26 = vector.load %arg5[%c0_16, %c256] : memref<128x512xbf16, #tpu.memory_space<vmem>>, vector<128x128xbf16>
    %cst_17 = arith.constant dense<0.000000e+00> : vector<8x128xf32>
    %27 = tpu.matmul %13, %26, %cst_17 {dimension_numbers = #tpu.dot_dimension_numbers<[1], [0], [0], [1], [0, 0, 1, 1], [], []>} : vector<8x128xbf16>, vector<128x128xbf16>, vector<8x128xf32> -> vector<8x128xf32>
    %28 = arith.addf %25, %27 : vector<8x128xf32>
    %29 = vector.extract_strided_slice %10 {offsets = [0, 0, 384], sizes = [1, 8, 128], strides = [1, 1, 1]} : vector<8x8x512xf32> to vector<1x8x128xf32>
    %30 = vector.shape_cast %29 : vector<1x8x128xf32> to vector<8x128xf32>
    %c0_18 = arith.constant 0 : index
    %c384 = arith.constant 384 : index
    %31 = vector.load %arg5[%c0_18, %c384] : memref<128x512xbf16, #tpu.memory_space<vmem>>, vector<128x128xbf16>
    %cst_19 = arith.constant dense<0.000000e+00> : vector<8x128xf32>
    %32 = tpu.matmul %13, %31, %cst_19 {dimension_numbers = #tpu.dot_dimension_numbers<[1], [0], [0], [1], [0, 0, 1, 1], [], []>} : vector<8x128xbf16>, vector<128x128xbf16>, vector<8x128xf32> -> vector<8x128xf32>
    %33 = arith.addf %30, %32 : vector<8x128xf32>
    %cst_20 = arith.constant 5.000000e-01 : f32
    %34 = vector.broadcast %cst_20 : f32 to vector<8x128xf32>
    %35 = arith.mulf %34, %18 : vector<8x128xf32>
    %36 = math.tanh %35 : vector<8x128xf32>
    %cst_21 = arith.constant 5.000000e-01 : f32
    %37 = vector.broadcast %cst_21 : f32 to vector<8x128xf32>
    %38 = arith.mulf %37, %36 : vector<8x128xf32>
    %cst_22 = arith.constant 5.000000e-01 : f32
    %39 = vector.broadcast %cst_22 : f32 to vector<8x128xf32>
    %40 = arith.addf %38, %39 : vector<8x128xf32>
    %cst_23 = arith.constant 5.000000e-01 : f32
    %41 = vector.broadcast %cst_23 : f32 to vector<8x128xf32>
    %42 = arith.mulf %41, %23 : vector<8x128xf32>
    %43 = math.tanh %42 : vector<8x128xf32>
    %cst_24 = arith.constant 5.000000e-01 : f32
    %44 = vector.broadcast %cst_24 : f32 to vector<8x128xf32>
    %45 = arith.mulf %44, %43 : vector<8x128xf32>
    %cst_25 = arith.constant 5.000000e-01 : f32
    %46 = vector.broadcast %cst_25 : f32 to vector<8x128xf32>
    %47 = arith.addf %45, %46 : vector<8x128xf32>
    %48 = math.tanh %28 : vector<8x128xf32>
    %cst_26 = arith.constant 5.000000e-01 : f32
    %49 = vector.broadcast %cst_26 : f32 to vector<8x128xf32>
    %50 = arith.mulf %49, %33 : vector<8x128xf32>
    %51 = math.tanh %50 : vector<8x128xf32>
    %cst_27 = arith.constant 5.000000e-01 : f32
    %52 = vector.broadcast %cst_27 : f32 to vector<8x128xf32>
    %53 = arith.mulf %52, %51 : vector<8x128xf32>
    %cst_28 = arith.constant 5.000000e-01 : f32
    %54 = vector.broadcast %cst_28 : f32 to vector<8x128xf32>
    %55 = arith.addf %53, %54 : vector<8x128xf32>
    %56 = arith.mulf %47, %12 : vector<8x128xf32>
    %57 = arith.mulf %40, %48 : vector<8x128xf32>
    %58 = arith.addf %56, %57 : vector<8x128xf32>
    %59 = math.tanh %58 : vector<8x128xf32>
    %60 = arith.mulf %55, %59 : vector<8x128xf32>
    %61 = arith.truncf %60 : vector<8x128xf32> to vector<8x128xbf16>
    %62 = vector.extract_strided_slice %10 {offsets = [1, 0, 0], sizes = [1, 8, 128], strides = [1, 1, 1]} : vector<8x8x512xf32> to vector<1x8x128xf32>
    %63 = vector.shape_cast %62 : vector<1x8x128xf32> to vector<8x128xf32>
    %c0_29 = arith.constant 0 : index
    %c0_30 = arith.constant 0 : index
    %64 = vector.load %arg5[%c0_29, %c0_30] : memref<128x512xbf16, #tpu.memory_space<vmem>>, vector<128x128xbf16>
    %cst_31 = arith.constant dense<0.000000e+00> : vector<8x128xf32>
    %65 = tpu.matmul %61, %64, %cst_31 {dimension_numbers = #tpu.dot_dimension_numbers<[1], [0], [0], [1], [0, 0, 1, 1], [], []>} : vector<8x128xbf16>, vector<128x128xbf16>, vector<8x128xf32> -> vector<8x128xf32>
    %66 = arith.addf %63, %65 : vector<8x128xf32>
    %67 = vector.extract_strided_slice %10 {offsets = [1, 0, 128], sizes = [1, 8, 128], strides = [1, 1, 1]} : vector<8x8x512xf32> to vector<1x8x128xf32>
    %68 = vector.shape_cast %67 : vector<1x8x128xf32> to vector<8x128xf32>
    %c0_32 = arith.constant 0 : index
    %c128_33 = arith.constant 128 : index
    %69 = vector.load %arg5[%c0_32, %c128_33] : memref<128x512xbf16, #tpu.memory_space<vmem>>, vector<128x128xbf16>
    %cst_34 = arith.constant dense<0.000000e+00> : vector<8x128xf32>
    %70 = tpu.matmul %61, %69, %cst_34 {dimension_numbers = #tpu.dot_dimension_numbers<[1], [0], [0], [1], [0, 0, 1, 1], [], []>} : vector<8x128xbf16>, vector<128x128xbf16>, vector<8x128xf32> -> vector<8x128xf32>
    %71 = arith.addf %68, %70 : vector<8x128xf32>
    %72 = vector.extract_strided_slice %10 {offsets = [1, 0, 256], sizes = [1, 8, 128], strides = [1, 1, 1]} : vector<8x8x512xf32> to vector<1x8x128xf32>
    %73 = vector.shape_cast %72 : vector<1x8x128xf32> to vector<8x128xf32>
    %c0_35 = arith.constant 0 : index
    %c256_36 = arith.constant 256 : index
    %74 = vector.load %arg5[%c0_35, %c256_36] : memref<128x512xbf16, #tpu.memory_space<vmem>>, vector<128x128xbf16>
    %cst_37 = arith.constant dense<0.000000e+00> : vector<8x128xf32>
    %75 = tpu.matmul %61, %74, %cst_37 {dimension_numbers = #tpu.dot_dimension_numbers<[1], [0], [0], [1], [0, 0, 1, 1], [], []>} : vector<8x128xbf16>, vector<128x128xbf16>, vector<8x128xf32> -> vector<8x128xf32>
    %76 = arith.addf %73, %75 : vector<8x128xf32>
    %77 = vector.extract_strided_slice %10 {offsets = [1, 0, 384], sizes = [1, 8, 128], strides = [1, 1, 1]} : vector<8x8x512xf32> to vector<1x8x128xf32>
    %78 = vector.shape_cast %77 : vector<1x8x128xf32> to vector<8x128xf32>
    %c0_38 = arith.constant 0 : index
    %c384_39 = arith.constant 384 : index
    %79 = vector.load %arg5[%c0_38, %c384_39] : memref<128x512xbf16, #tpu.memory_space<vmem>>, vector<128x128xbf16>
    %cst_40 = arith.constant dense<0.000000e+00> : vector<8x128xf32>
    %80 = tpu.matmul %61, %79, %cst_40 {dimension_numbers = #tpu.dot_dimension_numbers<[1], [0], [0], [1], [0, 0, 1, 1], [], []>} : vector<8x128xbf16>, vector<128x128xbf16>, vector<8x128xf32> -> vector<8x128xf32>
    %81 = arith.addf %78, %80 : vector<8x128xf32>
    %cst_41 = arith.constant 5.000000e-01 : f32
    %82 = vector.broadcast %cst_41 : f32 to vector<8x128xf32>
    %83 = arith.mulf %82, %66 : vector<8x128xf32>
    %84 = math.tanh %83 : vector<8x128xf32>
    %cst_42 = arith.constant 5.000000e-01 : f32
    %85 = vector.broadcast %cst_42 : f32 to vector<8x128xf32>
    %86 = arith.mulf %85, %84 : vector<8x128xf32>
    %cst_43 = arith.constant 5.000000e-01 : f32
    %87 = vector.broadcast %cst_43 : f32 to vector<8x128xf32>
    %88 = arith.addf %86, %87 : vector<8x128xf32>
    %cst_44 = arith.constant 5.000000e-01 : f32
    %89 = vector.broadcast %cst_44 : f32 to vector<8x128xf32>
    %90 = arith.mulf %89, %71 : vector<8x128xf32>
    %91 = math.tanh %90 : vector<8x128xf32>
    %cst_45 = arith.constant 5.000000e-01 : f32
    %92 = vector.broadcast %cst_45 : f32 to vector<8x128xf32>
    %93 = arith.mulf %92, %91 : vector<8x128xf32>
    %cst_46 = arith.constant 5.000000e-01 : f32
    %94 = vector.broadcast %cst_46 : f32 to vector<8x128xf32>
    %95 = arith.addf %93, %94 : vector<8x128xf32>
    %96 = math.tanh %76 : vector<8x128xf32>
    %cst_47 = arith.constant 5.000000e-01 : f32
    %97 = vector.broadcast %cst_47 : f32 to vector<8x128xf32>
    %98 = arith.mulf %97, %81 : vector<8x128xf32>
    %99 = math.tanh %98 : vector<8x128xf32>
    %cst_48 = arith.constant 5.000000e-01 : f32
    %100 = vector.broadcast %cst_48 : f32 to vector<8x128xf32>
    %101 = arith.mulf %100, %99 : vector<8x128xf32>
    %cst_49 = arith.constant 5.000000e-01 : f32
    %102 = vector.broadcast %cst_49 : f32 to vector<8x128xf32>
    %103 = arith.addf %101, %102 : vector<8x128xf32>
    %104 = arith.mulf %95, %58 : vector<8x128xf32>
    %105 = arith.mulf %88, %96 : vector<8x128xf32>
    %106 = arith.addf %104, %105 : vector<8x128xf32>
    %107 = math.tanh %106 : vector<8x128xf32>
    %108 = arith.mulf %103, %107 : vector<8x128xf32>
    %109 = arith.truncf %108 : vector<8x128xf32> to vector<8x128xbf16>
    %110 = vector.extract_strided_slice %10 {offsets = [2, 0, 0], sizes = [1, 8, 128], strides = [1, 1, 1]} : vector<8x8x512xf32> to vector<1x8x128xf32>
    %111 = vector.shape_cast %110 : vector<1x8x128xf32> to vector<8x128xf32>
    %c0_50 = arith.constant 0 : index
    %c0_51 = arith.constant 0 : index
    %112 = vector.load %arg5[%c0_50, %c0_51] : memref<128x512xbf16, #tpu.memory_space<vmem>>, vector<128x128xbf16>
    %cst_52 = arith.constant dense<0.000000e+00> : vector<8x128xf32>
    %113 = tpu.matmul %109, %112, %cst_52 {dimension_numbers = #tpu.dot_dimension_numbers<[1], [0], [0], [1], [0, 0, 1, 1], [], []>} : vector<8x128xbf16>, vector<128x128xbf16>, vector<8x128xf32> -> vector<8x128xf32>
    %114 = arith.addf %111, %113 : vector<8x128xf32>
    %115 = vector.extract_strided_slice %10 {offsets = [2, 0, 128], sizes = [1, 8, 128], strides = [1, 1, 1]} : vector<8x8x512xf32> to vector<1x8x128xf32>
    %116 = vector.shape_cast %115 : vector<1x8x128xf32> to vector<8x128xf32>
    %c0_53 = arith.constant 0 : index
    %c128_54 = arith.constant 128 : index
    %117 = vector.load %arg5[%c0_53, %c128_54] : memref<128x512xbf16, #tpu.memory_space<vmem>>, vector<128x128xbf16>
    %cst_55 = arith.constant dense<0.000000e+00> : vector<8x128xf32>
    %118 = tpu.matmul %109, %117, %cst_55 {dimension_numbers = #tpu.dot_dimension_numbers<[1], [0], [0], [1], [0, 0, 1, 1], [], []>} : vector<8x128xbf16>, vector<128x128xbf16>, vector<8x128xf32> -> vector<8x128xf32>
    %119 = arith.addf %116, %118 : vector<8x128xf32>
    %120 = vector.extract_strided_slice %10 {offsets = [2, 0, 256], sizes = [1, 8, 128], strides = [1, 1, 1]} : vector<8x8x512xf32> to vector<1x8x128xf32>
    %121 = vector.shape_cast %120 : vector<1x8x128xf32> to vector<8x128xf32>
    %c0_56 = arith.constant 0 : index
    %c256_57 = arith.constant 256 : index
    %122 = vector.load %arg5[%c0_56, %c256_57] : memref<128x512xbf16, #tpu.memory_space<vmem>>, vector<128x128xbf16>
    %cst_58 = arith.constant dense<0.000000e+00> : vector<8x128xf32>
    %123 = tpu.matmul %109, %122, %cst_58 {dimension_numbers = #tpu.dot_dimension_numbers<[1], [0], [0], [1], [0, 0, 1, 1], [], []>} : vector<8x128xbf16>, vector<128x128xbf16>, vector<8x128xf32> -> vector<8x128xf32>
    %124 = arith.addf %121, %123 : vector<8x128xf32>
    %125 = vector.extract_strided_slice %10 {offsets = [2, 0, 384], sizes = [1, 8, 128], strides = [1, 1, 1]} : vector<8x8x512xf32> to vector<1x8x128xf32>
    %126 = vector.shape_cast %125 : vector<1x8x128xf32> to vector<8x128xf32>
    %c0_59 = arith.constant 0 : index
    %c384_60 = arith.constant 384 : index
    %127 = vector.load %arg5[%c0_59, %c384_60] : memref<128x512xbf16, #tpu.memory_space<vmem>>, vector<128x128xbf16>
    %cst_61 = arith.constant dense<0.000000e+00> : vector<8x128xf32>
    %128 = tpu.matmul %109, %127, %cst_61 {dimension_numbers = #tpu.dot_dimension_numbers<[1], [0], [0], [1], [0, 0, 1, 1], [], []>} : vector<8x128xbf16>, vector<128x128xbf16>, vector<8x128xf32> -> vector<8x128xf32>
    %129 = arith.addf %126, %128 : vector<8x128xf32>
    %cst_62 = arith.constant 5.000000e-01 : f32
    %130 = vector.broadcast %cst_62 : f32 to vector<8x128xf32>
    %131 = arith.mulf %130, %114 : vector<8x128xf32>
    %132 = math.tanh %131 : vector<8x128xf32>
    %cst_63 = arith.constant 5.000000e-01 : f32
    %133 = vector.broadcast %cst_63 : f32 to vector<8x128xf32>
    %134 = arith.mulf %133, %132 : vector<8x128xf32>
    %cst_64 = arith.constant 5.000000e-01 : f32
    %135 = vector.broadcast %cst_64 : f32 to vector<8x128xf32>
    %136 = arith.addf %134, %135 : vector<8x128xf32>
    %cst_65 = arith.constant 5.000000e-01 : f32
    %137 = vector.broadcast %cst_65 : f32 to vector<8x128xf32>
    %138 = arith.mulf %137, %119 : vector<8x128xf32>
    %139 = math.tanh %138 : vector<8x128xf32>
    %cst_66 = arith.constant 5.000000e-01 : f32
    %140 = vector.broadcast %cst_66 : f32 to vector<8x128xf32>
    %141 = arith.mulf %140, %139 : vector<8x128xf32>
    %cst_67 = arith.constant 5.000000e-01 : f32
    %142 = vector.broadcast %cst_67 : f32 to vector<8x128xf32>
    %143 = arith.addf %141, %142 : vector<8x128xf32>
    %144 = math.tanh %124 : vector<8x128xf32>
    %cst_68 = arith.constant 5.000000e-01 : f32
    %145 = vector.broadcast %cst_68 : f32 to vector<8x128xf32>
    %146 = arith.mulf %145, %129 : vector<8x128xf32>
    %147 = math.tanh %146 : vector<8x128xf32>
    %cst_69 = arith.constant 5.000000e-01 : f32
    %148 = vector.broadcast %cst_69 : f32 to vector<8x128xf32>
    %149 = arith.mulf %148, %147 : vector<8x128xf32>
    %cst_70 = arith.constant 5.000000e-01 : f32
    %150 = vector.broadcast %cst_70 : f32 to vector<8x128xf32>
    %151 = arith.addf %149, %150 : vector<8x128xf32>
    %152 = arith.mulf %143, %106 : vector<8x128xf32>
    %153 = arith.mulf %136, %144 : vector<8x128xf32>
    %154 = arith.addf %152, %153 : vector<8x128xf32>
    %155 = math.tanh %154 : vector<8x128xf32>
    %156 = arith.mulf %151, %155 : vector<8x128xf32>
    %157 = arith.truncf %156 : vector<8x128xf32> to vector<8x128xbf16>
    %158 = vector.extract_strided_slice %10 {offsets = [3, 0, 0], sizes = [1, 8, 128], strides = [1, 1, 1]} : vector<8x8x512xf32> to vector<1x8x128xf32>
    %159 = vector.shape_cast %158 : vector<1x8x128xf32> to vector<8x128xf32>
    %c0_71 = arith.constant 0 : index
    %c0_72 = arith.constant 0 : index
    %160 = vector.load %arg5[%c0_71, %c0_72] : memref<128x512xbf16, #tpu.memory_space<vmem>>, vector<128x128xbf16>
    %cst_73 = arith.constant dense<0.000000e+00> : vector<8x128xf32>
    %161 = tpu.matmul %157, %160, %cst_73 {dimension_numbers = #tpu.dot_dimension_numbers<[1], [0], [0], [1], [0, 0, 1, 1], [], []>} : vector<8x128xbf16>, vector<128x128xbf16>, vector<8x128xf32> -> vector<8x128xf32>
    %162 = arith.addf %159, %161 : vector<8x128xf32>
    %163 = vector.extract_strided_slice %10 {offsets = [3, 0, 128], sizes = [1, 8, 128], strides = [1, 1, 1]} : vector<8x8x512xf32> to vector<1x8x128xf32>
    %164 = vector.shape_cast %163 : vector<1x8x128xf32> to vector<8x128xf32>
    %c0_74 = arith.constant 0 : index
    %c128_75 = arith.constant 128 : index
    %165 = vector.load %arg5[%c0_74, %c128_75] : memref<128x512xbf16, #tpu.memory_space<vmem>>, vector<128x128xbf16>
    %cst_76 = arith.constant dense<0.000000e+00> : vector<8x128xf32>
    %166 = tpu.matmul %157, %165, %cst_76 {dimension_numbers = #tpu.dot_dimension_numbers<[1], [0], [0], [1], [0, 0, 1, 1], [], []>} : vector<8x128xbf16>, vector<128x128xbf16>, vector<8x128xf32> -> vector<8x128xf32>
    %167 = arith.addf %164, %166 : vector<8x128xf32>
    %168 = vector.extract_strided_slice %10 {offsets = [3, 0, 256], sizes = [1, 8, 128], strides = [1, 1, 1]} : vector<8x8x512xf32> to vector<1x8x128xf32>
    %169 = vector.shape_cast %168 : vector<1x8x128xf32> to vector<8x128xf32>
    %c0_77 = arith.constant 0 : index
    %c256_78 = arith.constant 256 : index
    %170 = vector.load %arg5[%c0_77, %c256_78] : memref<128x512xbf16, #tpu.memory_space<vmem>>, vector<128x128xbf16>
    %cst_79 = arith.constant dense<0.000000e+00> : vector<8x128xf32>
    %171 = tpu.matmul %157, %170, %cst_79 {dimension_numbers = #tpu.dot_dimension_numbers<[1], [0], [0], [1], [0, 0, 1, 1], [], []>} : vector<8x128xbf16>, vector<128x128xbf16>, vector<8x128xf32> -> vector<8x128xf32>
    %172 = arith.addf %169, %171 : vector<8x128xf32>
    %173 = vector.extract_strided_slice %10 {offsets = [3, 0, 384], sizes = [1, 8, 128], strides = [1, 1, 1]} : vector<8x8x512xf32> to vector<1x8x128xf32>
    %174 = vector.shape_cast %173 : vector<1x8x128xf32> to vector<8x128xf32>
    %c0_80 = arith.constant 0 : index
    %c384_81 = arith.constant 384 : index
    %175 = vector.load %arg5[%c0_80, %c384_81] : memref<128x512xbf16, #tpu.memory_space<vmem>>, vector<128x128xbf16>
    %cst_82 = arith.constant dense<0.000000e+00> : vector<8x128xf32>
    %176 = tpu.matmul %157, %175, %cst_82 {dimension_numbers = #tpu.dot_dimension_numbers<[1], [0], [0], [1], [0, 0, 1, 1], [], []>} : vector<8x128xbf16>, vector<128x128xbf16>, vector<8x128xf32> -> vector<8x128xf32>
    %177 = arith.addf %174, %176 : vector<8x128xf32>
    %cst_83 = arith.constant 5.000000e-01 : f32
    %178 = vector.broadcast %cst_83 : f32 to vector<8x128xf32>
    %179 = arith.mulf %178, %162 : vector<8x128xf32>
    %180 = math.tanh %179 : vector<8x128xf32>
    %cst_84 = arith.constant 5.000000e-01 : f32
    %181 = vector.broadcast %cst_84 : f32 to vector<8x128xf32>
    %182 = arith.mulf %181, %180 : vector<8x128xf32>
    %cst_85 = arith.constant 5.000000e-01 : f32
    %183 = vector.broadcast %cst_85 : f32 to vector<8x128xf32>
    %184 = arith.addf %182, %183 : vector<8x128xf32>
    %cst_86 = arith.constant 5.000000e-01 : f32
    %185 = vector.broadcast %cst_86 : f32 to vector<8x128xf32>
    %186 = arith.mulf %185, %167 : vector<8x128xf32>
    %187 = math.tanh %186 : vector<8x128xf32>
    %cst_87 = arith.constant 5.000000e-01 : f32
    %188 = vector.broadcast %cst_87 : f32 to vector<8x128xf32>
    %189 = arith.mulf %188, %187 : vector<8x128xf32>
    %cst_88 = arith.constant 5.000000e-01 : f32
    %190 = vector.broadcast %cst_88 : f32 to vector<8x128xf32>
    %191 = arith.addf %189, %190 : vector<8x128xf32>
    %192 = math.tanh %172 : vector<8x128xf32>
    %cst_89 = arith.constant 5.000000e-01 : f32
    %193 = vector.broadcast %cst_89 : f32 to vector<8x128xf32>
    %194 = arith.mulf %193, %177 : vector<8x128xf32>
    %195 = math.tanh %194 : vector<8x128xf32>
    %cst_90 = arith.constant 5.000000e-01 : f32
    %196 = vector.broadcast %cst_90 : f32 to vector<8x128xf32>
    %197 = arith.mulf %196, %195 : vector<8x128xf32>
    %cst_91 = arith.constant 5.000000e-01 : f32
    %198 = vector.broadcast %cst_91 : f32 to vector<8x128xf32>
    %199 = arith.addf %197, %198 : vector<8x128xf32>
    %200 = arith.mulf %191, %154 : vector<8x128xf32>
    %201 = arith.mulf %184, %192 : vector<8x128xf32>
    %202 = arith.addf %200, %201 : vector<8x128xf32>
    %203 = math.tanh %202 : vector<8x128xf32>
    %204 = arith.mulf %199, %203 : vector<8x128xf32>
    %205 = arith.truncf %204 : vector<8x128xf32> to vector<8x128xbf16>
    %206 = vector.extract_strided_slice %10 {offsets = [4, 0, 0], sizes = [1, 8, 128], strides = [1, 1, 1]} : vector<8x8x512xf32> to vector<1x8x128xf32>
    %207 = vector.shape_cast %206 : vector<1x8x128xf32> to vector<8x128xf32>
    %c0_92 = arith.constant 0 : index
    %c0_93 = arith.constant 0 : index
    %208 = vector.load %arg5[%c0_92, %c0_93] : memref<128x512xbf16, #tpu.memory_space<vmem>>, vector<128x128xbf16>
    %cst_94 = arith.constant dense<0.000000e+00> : vector<8x128xf32>
    %209 = tpu.matmul %205, %208, %cst_94 {dimension_numbers = #tpu.dot_dimension_numbers<[1], [0], [0], [1], [0, 0, 1, 1], [], []>} : vector<8x128xbf16>, vector<128x128xbf16>, vector<8x128xf32> -> vector<8x128xf32>
    %210 = arith.addf %207, %209 : vector<8x128xf32>
    %211 = vector.extract_strided_slice %10 {offsets = [4, 0, 128], sizes = [1, 8, 128], strides = [1, 1, 1]} : vector<8x8x512xf32> to vector<1x8x128xf32>
    %212 = vector.shape_cast %211 : vector<1x8x128xf32> to vector<8x128xf32>
    %c0_95 = arith.constant 0 : index
    %c128_96 = arith.constant 128 : index
    %213 = vector.load %arg5[%c0_95, %c128_96] : memref<128x512xbf16, #tpu.memory_space<vmem>>, vector<128x128xbf16>
    %cst_97 = arith.constant dense<0.000000e+00> : vector<8x128xf32>
    %214 = tpu.matmul %205, %213, %cst_97 {dimension_numbers = #tpu.dot_dimension_numbers<[1], [0], [0], [1], [0, 0, 1, 1], [], []>} : vector<8x128xbf16>, vector<128x128xbf16>, vector<8x128xf32> -> vector<8x128xf32>
    %215 = arith.addf %212, %214 : vector<8x128xf32>
    %216 = vector.extract_strided_slice %10 {offsets = [4, 0, 256], sizes = [1, 8, 128], strides = [1, 1, 1]} : vector<8x8x512xf32> to vector<1x8x128xf32>
    %217 = vector.shape_cast %216 : vector<1x8x128xf32> to vector<8x128xf32>
    %c0_98 = arith.constant 0 : index
    %c256_99 = arith.constant 256 : index
    %218 = vector.load %arg5[%c0_98, %c256_99] : memref<128x512xbf16, #tpu.memory_space<vmem>>, vector<128x128xbf16>
    %cst_100 = arith.constant dense<0.000000e+00> : vector<8x128xf32>
    %219 = tpu.matmul %205, %218, %cst_100 {dimension_numbers = #tpu.dot_dimension_numbers<[1], [0], [0], [1], [0, 0, 1, 1], [], []>} : vector<8x128xbf16>, vector<128x128xbf16>, vector<8x128xf32> -> vector<8x128xf32>
    %220 = arith.addf %217, %219 : vector<8x128xf32>
    %221 = vector.extract_strided_slice %10 {offsets = [4, 0, 384], sizes = [1, 8, 128], strides = [1, 1, 1]} : vector<8x8x512xf32> to vector<1x8x128xf32>
    %222 = vector.shape_cast %221 : vector<1x8x128xf32> to vector<8x128xf32>
    %c0_101 = arith.constant 0 : index
    %c384_102 = arith.constant 384 : index
    %223 = vector.load %arg5[%c0_101, %c384_102] : memref<128x512xbf16, #tpu.memory_space<vmem>>, vector<128x128xbf16>
    %cst_103 = arith.constant dense<0.000000e+00> : vector<8x128xf32>
    %224 = tpu.matmul %205, %223, %cst_103 {dimension_numbers = #tpu.dot_dimension_numbers<[1], [0], [0], [1], [0, 0, 1, 1], [], []>} : vector<8x128xbf16>, vector<128x128xbf16>, vector<8x128xf32> -> vector<8x128xf32>
    %225 = arith.addf %222, %224 : vector<8x128xf32>
    %cst_104 = arith.constant 5.000000e-01 : f32
    %226 = vector.broadcast %cst_104 : f32 to vector<8x128xf32>
    %227 = arith.mulf %226, %210 : vector<8x128xf32>
    %228 = math.tanh %227 : vector<8x128xf32>
    %cst_105 = arith.constant 5.000000e-01 : f32
    %229 = vector.broadcast %cst_105 : f32 to vector<8x128xf32>
    %230 = arith.mulf %229, %228 : vector<8x128xf32>
    %cst_106 = arith.constant 5.000000e-01 : f32
    %231 = vector.broadcast %cst_106 : f32 to vector<8x128xf32>
    %232 = arith.addf %230, %231 : vector<8x128xf32>
    %cst_107 = arith.constant 5.000000e-01 : f32
    %233 = vector.broadcast %cst_107 : f32 to vector<8x128xf32>
    %234 = arith.mulf %233, %215 : vector<8x128xf32>
    %235 = math.tanh %234 : vector<8x128xf32>
    %cst_108 = arith.constant 5.000000e-01 : f32
    %236 = vector.broadcast %cst_108 : f32 to vector<8x128xf32>
    %237 = arith.mulf %236, %235 : vector<8x128xf32>
    %cst_109 = arith.constant 5.000000e-01 : f32
    %238 = vector.broadcast %cst_109 : f32 to vector<8x128xf32>
    %239 = arith.addf %237, %238 : vector<8x128xf32>
    %240 = math.tanh %220 : vector<8x128xf32>
    %cst_110 = arith.constant 5.000000e-01 : f32
    %241 = vector.broadcast %cst_110 : f32 to vector<8x128xf32>
    %242 = arith.mulf %241, %225 : vector<8x128xf32>
    %243 = math.tanh %242 : vector<8x128xf32>
    %cst_111 = arith.constant 5.000000e-01 : f32
    %244 = vector.broadcast %cst_111 : f32 to vector<8x128xf32>
    %245 = arith.mulf %244, %243 : vector<8x128xf32>
    %cst_112 = arith.constant 5.000000e-01 : f32
    %246 = vector.broadcast %cst_112 : f32 to vector<8x128xf32>
    %247 = arith.addf %245, %246 : vector<8x128xf32>
    %248 = arith.mulf %239, %202 : vector<8x128xf32>
    %249 = arith.mulf %232, %240 : vector<8x128xf32>
    %250 = arith.addf %248, %249 : vector<8x128xf32>
    %251 = math.tanh %250 : vector<8x128xf32>
    %252 = arith.mulf %247, %251 : vector<8x128xf32>
    %253 = arith.truncf %252 : vector<8x128xf32> to vector<8x128xbf16>
    %254 = vector.extract_strided_slice %10 {offsets = [5, 0, 0], sizes = [1, 8, 128], strides = [1, 1, 1]} : vector<8x8x512xf32> to vector<1x8x128xf32>
    %255 = vector.shape_cast %254 : vector<1x8x128xf32> to vector<8x128xf32>
    %c0_113 = arith.constant 0 : index
    %c0_114 = arith.constant 0 : index
    %256 = vector.load %arg5[%c0_113, %c0_114] : memref<128x512xbf16, #tpu.memory_space<vmem>>, vector<128x128xbf16>
    %cst_115 = arith.constant dense<0.000000e+00> : vector<8x128xf32>
    %257 = tpu.matmul %253, %256, %cst_115 {dimension_numbers = #tpu.dot_dimension_numbers<[1], [0], [0], [1], [0, 0, 1, 1], [], []>} : vector<8x128xbf16>, vector<128x128xbf16>, vector<8x128xf32> -> vector<8x128xf32>
    %258 = arith.addf %255, %257 : vector<8x128xf32>
    %259 = vector.extract_strided_slice %10 {offsets = [5, 0, 128], sizes = [1, 8, 128], strides = [1, 1, 1]} : vector<8x8x512xf32> to vector<1x8x128xf32>
    %260 = vector.shape_cast %259 : vector<1x8x128xf32> to vector<8x128xf32>
    %c0_116 = arith.constant 0 : index
    %c128_117 = arith.constant 128 : index
    %261 = vector.load %arg5[%c0_116, %c128_117] : memref<128x512xbf16, #tpu.memory_space<vmem>>, vector<128x128xbf16>
    %cst_118 = arith.constant dense<0.000000e+00> : vector<8x128xf32>
    %262 = tpu.matmul %253, %261, %cst_118 {dimension_numbers = #tpu.dot_dimension_numbers<[1], [0], [0], [1], [0, 0, 1, 1], [], []>} : vector<8x128xbf16>, vector<128x128xbf16>, vector<8x128xf32> -> vector<8x128xf32>
    %263 = arith.addf %260, %262 : vector<8x128xf32>
    %264 = vector.extract_strided_slice %10 {offsets = [5, 0, 256], sizes = [1, 8, 128], strides = [1, 1, 1]} : vector<8x8x512xf32> to vector<1x8x128xf32>
    %265 = vector.shape_cast %264 : vector<1x8x128xf32> to vector<8x128xf32>
    %c0_119 = arith.constant 0 : index
    %c256_120 = arith.constant 256 : index
    %266 = vector.load %arg5[%c0_119, %c256_120] : memref<128x512xbf16, #tpu.memory_space<vmem>>, vector<128x128xbf16>
    %cst_121 = arith.constant dense<0.000000e+00> : vector<8x128xf32>
    %267 = tpu.matmul %253, %266, %cst_121 {dimension_numbers = #tpu.dot_dimension_numbers<[1], [0], [0], [1], [0, 0, 1, 1], [], []>} : vector<8x128xbf16>, vector<128x128xbf16>, vector<8x128xf32> -> vector<8x128xf32>
    %268 = arith.addf %265, %267 : vector<8x128xf32>
    %269 = vector.extract_strided_slice %10 {offsets = [5, 0, 384], sizes = [1, 8, 128], strides = [1, 1, 1]} : vector<8x8x512xf32> to vector<1x8x128xf32>
    %270 = vector.shape_cast %269 : vector<1x8x128xf32> to vector<8x128xf32>
    %c0_122 = arith.constant 0 : index
    %c384_123 = arith.constant 384 : index
    %271 = vector.load %arg5[%c0_122, %c384_123] : memref<128x512xbf16, #tpu.memory_space<vmem>>, vector<128x128xbf16>
    %cst_124 = arith.constant dense<0.000000e+00> : vector<8x128xf32>
    %272 = tpu.matmul %253, %271, %cst_124 {dimension_numbers = #tpu.dot_dimension_numbers<[1], [0], [0], [1], [0, 0, 1, 1], [], []>} : vector<8x128xbf16>, vector<128x128xbf16>, vector<8x128xf32> -> vector<8x128xf32>
    %273 = arith.addf %270, %272 : vector<8x128xf32>
    %cst_125 = arith.constant 5.000000e-01 : f32
    %274 = vector.broadcast %cst_125 : f32 to vector<8x128xf32>
    %275 = arith.mulf %274, %258 : vector<8x128xf32>
    %276 = math.tanh %275 : vector<8x128xf32>
    %cst_126 = arith.constant 5.000000e-01 : f32
    %277 = vector.broadcast %cst_126 : f32 to vector<8x128xf32>
    %278 = arith.mulf %277, %276 : vector<8x128xf32>
    %cst_127 = arith.constant 5.000000e-01 : f32
    %279 = vector.broadcast %cst_127 : f32 to vector<8x128xf32>
    %280 = arith.addf %278, %279 : vector<8x128xf32>
    %cst_128 = arith.constant 5.000000e-01 : f32
    %281 = vector.broadcast %cst_128 : f32 to vector<8x128xf32>
    %282 = arith.mulf %281, %263 : vector<8x128xf32>
    %283 = math.tanh %282 : vector<8x128xf32>
    %cst_129 = arith.constant 5.000000e-01 : f32
    %284 = vector.broadcast %cst_129 : f32 to vector<8x128xf32>
    %285 = arith.mulf %284, %283 : vector<8x128xf32>
    %cst_130 = arith.constant 5.000000e-01 : f32
    %286 = vector.broadcast %cst_130 : f32 to vector<8x128xf32>
    %287 = arith.addf %285, %286 : vector<8x128xf32>
    %288 = math.tanh %268 : vector<8x128xf32>
    %cst_131 = arith.constant 5.000000e-01 : f32
    %289 = vector.broadcast %cst_131 : f32 to vector<8x128xf32>
    %290 = arith.mulf %289, %273 : vector<8x128xf32>
    %291 = math.tanh %290 : vector<8x128xf32>
    %cst_132 = arith.constant 5.000000e-01 : f32
    %292 = vector.broadcast %cst_132 : f32 to vector<8x128xf32>
    %293 = arith.mulf %292, %291 : vector<8x128xf32>
    %cst_133 = arith.constant 5.000000e-01 : f32
    %294 = vector.broadcast %cst_133 : f32 to vector<8x128xf32>
    %295 = arith.addf %293, %294 : vector<8x128xf32>
    %296 = arith.mulf %287, %250 : vector<8x128xf32>
    %297 = arith.mulf %280, %288 : vector<8x128xf32>
    %298 = arith.addf %296, %297 : vector<8x128xf32>
    %299 = math.tanh %298 : vector<8x128xf32>
    %300 = arith.mulf %295, %299 : vector<8x128xf32>
    %301 = arith.truncf %300 : vector<8x128xf32> to vector<8x128xbf16>
    %302 = vector.extract_strided_slice %10 {offsets = [6, 0, 0], sizes = [1, 8, 128], strides = [1, 1, 1]} : vector<8x8x512xf32> to vector<1x8x128xf32>
    %303 = vector.shape_cast %302 : vector<1x8x128xf32> to vector<8x128xf32>
    %c0_134 = arith.constant 0 : index
    %c0_135 = arith.constant 0 : index
    %304 = vector.load %arg5[%c0_134, %c0_135] : memref<128x512xbf16, #tpu.memory_space<vmem>>, vector<128x128xbf16>
    %cst_136 = arith.constant dense<0.000000e+00> : vector<8x128xf32>
    %305 = tpu.matmul %301, %304, %cst_136 {dimension_numbers = #tpu.dot_dimension_numbers<[1], [0], [0], [1], [0, 0, 1, 1], [], []>} : vector<8x128xbf16>, vector<128x128xbf16>, vector<8x128xf32> -> vector<8x128xf32>
    %306 = arith.addf %303, %305 : vector<8x128xf32>
    %307 = vector.extract_strided_slice %10 {offsets = [6, 0, 128], sizes = [1, 8, 128], strides = [1, 1, 1]} : vector<8x8x512xf32> to vector<1x8x128xf32>
    %308 = vector.shape_cast %307 : vector<1x8x128xf32> to vector<8x128xf32>
    %c0_137 = arith.constant 0 : index
    %c128_138 = arith.constant 128 : index
    %309 = vector.load %arg5[%c0_137, %c128_138] : memref<128x512xbf16, #tpu.memory_space<vmem>>, vector<128x128xbf16>
    %cst_139 = arith.constant dense<0.000000e+00> : vector<8x128xf32>
    %310 = tpu.matmul %301, %309, %cst_139 {dimension_numbers = #tpu.dot_dimension_numbers<[1], [0], [0], [1], [0, 0, 1, 1], [], []>} : vector<8x128xbf16>, vector<128x128xbf16>, vector<8x128xf32> -> vector<8x128xf32>
    %311 = arith.addf %308, %310 : vector<8x128xf32>
    %312 = vector.extract_strided_slice %10 {offsets = [6, 0, 256], sizes = [1, 8, 128], strides = [1, 1, 1]} : vector<8x8x512xf32> to vector<1x8x128xf32>
    %313 = vector.shape_cast %312 : vector<1x8x128xf32> to vector<8x128xf32>
    %c0_140 = arith.constant 0 : index
    %c256_141 = arith.constant 256 : index
    %314 = vector.load %arg5[%c0_140, %c256_141] : memref<128x512xbf16, #tpu.memory_space<vmem>>, vector<128x128xbf16>
    %cst_142 = arith.constant dense<0.000000e+00> : vector<8x128xf32>
    %315 = tpu.matmul %301, %314, %cst_142 {dimension_numbers = #tpu.dot_dimension_numbers<[1], [0], [0], [1], [0, 0, 1, 1], [], []>} : vector<8x128xbf16>, vector<128x128xbf16>, vector<8x128xf32> -> vector<8x128xf32>
    %316 = arith.addf %313, %315 : vector<8x128xf32>
    %317 = vector.extract_strided_slice %10 {offsets = [6, 0, 384], sizes = [1, 8, 128], strides = [1, 1, 1]} : vector<8x8x512xf32> to vector<1x8x128xf32>
    %318 = vector.shape_cast %317 : vector<1x8x128xf32> to vector<8x128xf32>
    %c0_143 = arith.constant 0 : index
    %c384_144 = arith.constant 384 : index
    %319 = vector.load %arg5[%c0_143, %c384_144] : memref<128x512xbf16, #tpu.memory_space<vmem>>, vector<128x128xbf16>
    %cst_145 = arith.constant dense<0.000000e+00> : vector<8x128xf32>
    %320 = tpu.matmul %301, %319, %cst_145 {dimension_numbers = #tpu.dot_dimension_numbers<[1], [0], [0], [1], [0, 0, 1, 1], [], []>} : vector<8x128xbf16>, vector<128x128xbf16>, vector<8x128xf32> -> vector<8x128xf32>
    %321 = arith.addf %318, %320 : vector<8x128xf32>
    %cst_146 = arith.constant 5.000000e-01 : f32
    %322 = vector.broadcast %cst_146 : f32 to vector<8x128xf32>
    %323 = arith.mulf %322, %306 : vector<8x128xf32>
    %324 = math.tanh %323 : vector<8x128xf32>
    %cst_147 = arith.constant 5.000000e-01 : f32
    %325 = vector.broadcast %cst_147 : f32 to vector<8x128xf32>
    %326 = arith.mulf %325, %324 : vector<8x128xf32>
    %cst_148 = arith.constant 5.000000e-01 : f32
    %327 = vector.broadcast %cst_148 : f32 to vector<8x128xf32>
    %328 = arith.addf %326, %327 : vector<8x128xf32>
    %cst_149 = arith.constant 5.000000e-01 : f32
    %329 = vector.broadcast %cst_149 : f32 to vector<8x128xf32>
    %330 = arith.mulf %329, %311 : vector<8x128xf32>
    %331 = math.tanh %330 : vector<8x128xf32>
    %cst_150 = arith.constant 5.000000e-01 : f32
    %332 = vector.broadcast %cst_150 : f32 to vector<8x128xf32>
    %333 = arith.mulf %332, %331 : vector<8x128xf32>
    %cst_151 = arith.constant 5.000000e-01 : f32
    %334 = vector.broadcast %cst_151 : f32 to vector<8x128xf32>
    %335 = arith.addf %333, %334 : vector<8x128xf32>
    %336 = math.tanh %316 : vector<8x128xf32>
    %cst_152 = arith.constant 5.000000e-01 : f32
    %337 = vector.broadcast %cst_152 : f32 to vector<8x128xf32>
    %338 = arith.mulf %337, %321 : vector<8x128xf32>
    %339 = math.tanh %338 : vector<8x128xf32>
    %cst_153 = arith.constant 5.000000e-01 : f32
    %340 = vector.broadcast %cst_153 : f32 to vector<8x128xf32>
    %341 = arith.mulf %340, %339 : vector<8x128xf32>
    %cst_154 = arith.constant 5.000000e-01 : f32
    %342 = vector.broadcast %cst_154 : f32 to vector<8x128xf32>
    %343 = arith.addf %341, %342 : vector<8x128xf32>
    %344 = arith.mulf %335, %298 : vector<8x128xf32>
    %345 = arith.mulf %328, %336 : vector<8x128xf32>
    %346 = arith.addf %344, %345 : vector<8x128xf32>
    %347 = math.tanh %346 : vector<8x128xf32>
    %348 = arith.mulf %343, %347 : vector<8x128xf32>
    %349 = arith.truncf %348 : vector<8x128xf32> to vector<8x128xbf16>
    %350 = vector.extract_strided_slice %10 {offsets = [7, 0, 0], sizes = [1, 8, 128], strides = [1, 1, 1]} : vector<8x8x512xf32> to vector<1x8x128xf32>
    %351 = vector.shape_cast %350 : vector<1x8x128xf32> to vector<8x128xf32>
    %c0_155 = arith.constant 0 : index
    %c0_156 = arith.constant 0 : index
    %352 = vector.load %arg5[%c0_155, %c0_156] : memref<128x512xbf16, #tpu.memory_space<vmem>>, vector<128x128xbf16>
    %cst_157 = arith.constant dense<0.000000e+00> : vector<8x128xf32>
    %353 = tpu.matmul %349, %352, %cst_157 {dimension_numbers = #tpu.dot_dimension_numbers<[1], [0], [0], [1], [0, 0, 1, 1], [], []>} : vector<8x128xbf16>, vector<128x128xbf16>, vector<8x128xf32> -> vector<8x128xf32>
    %354 = arith.addf %351, %353 : vector<8x128xf32>
    %355 = vector.extract_strided_slice %10 {offsets = [7, 0, 128], sizes = [1, 8, 128], strides = [1, 1, 1]} : vector<8x8x512xf32> to vector<1x8x128xf32>
    %356 = vector.shape_cast %355 : vector<1x8x128xf32> to vector<8x128xf32>
    %c0_158 = arith.constant 0 : index
    %c128_159 = arith.constant 128 : index
    %357 = vector.load %arg5[%c0_158, %c128_159] : memref<128x512xbf16, #tpu.memory_space<vmem>>, vector<128x128xbf16>
    %cst_160 = arith.constant dense<0.000000e+00> : vector<8x128xf32>
    %358 = tpu.matmul %349, %357, %cst_160 {dimension_numbers = #tpu.dot_dimension_numbers<[1], [0], [0], [1], [0, 0, 1, 1], [], []>} : vector<8x128xbf16>, vector<128x128xbf16>, vector<8x128xf32> -> vector<8x128xf32>
    %359 = arith.addf %356, %358 : vector<8x128xf32>
    %360 = vector.extract_strided_slice %10 {offsets = [7, 0, 256], sizes = [1, 8, 128], strides = [1, 1, 1]} : vector<8x8x512xf32> to vector<1x8x128xf32>
    %361 = vector.shape_cast %360 : vector<1x8x128xf32> to vector<8x128xf32>
    %c0_161 = arith.constant 0 : index
    %c256_162 = arith.constant 256 : index
    %362 = vector.load %arg5[%c0_161, %c256_162] : memref<128x512xbf16, #tpu.memory_space<vmem>>, vector<128x128xbf16>
    %cst_163 = arith.constant dense<0.000000e+00> : vector<8x128xf32>
    %363 = tpu.matmul %349, %362, %cst_163 {dimension_numbers = #tpu.dot_dimension_numbers<[1], [0], [0], [1], [0, 0, 1, 1], [], []>} : vector<8x128xbf16>, vector<128x128xbf16>, vector<8x128xf32> -> vector<8x128xf32>
    %364 = arith.addf %361, %363 : vector<8x128xf32>
    %365 = vector.extract_strided_slice %10 {offsets = [7, 0, 384], sizes = [1, 8, 128], strides = [1, 1, 1]} : vector<8x8x512xf32> to vector<1x8x128xf32>
    %366 = vector.shape_cast %365 : vector<1x8x128xf32> to vector<8x128xf32>
    %c0_164 = arith.constant 0 : index
    %c384_165 = arith.constant 384 : index
    %367 = vector.load %arg5[%c0_164, %c384_165] : memref<128x512xbf16, #tpu.memory_space<vmem>>, vector<128x128xbf16>
    %cst_166 = arith.constant dense<0.000000e+00> : vector<8x128xf32>
    %368 = tpu.matmul %349, %367, %cst_166 {dimension_numbers = #tpu.dot_dimension_numbers<[1], [0], [0], [1], [0, 0, 1, 1], [], []>} : vector<8x128xbf16>, vector<128x128xbf16>, vector<8x128xf32> -> vector<8x128xf32>
    %369 = arith.addf %366, %368 : vector<8x128xf32>
    %cst_167 = arith.constant 5.000000e-01 : f32
    %370 = vector.broadcast %cst_167 : f32 to vector<8x128xf32>
    %371 = arith.mulf %370, %354 : vector<8x128xf32>
    %372 = math.tanh %371 : vector<8x128xf32>
    %cst_168 = arith.constant 5.000000e-01 : f32
    %373 = vector.broadcast %cst_168 : f32 to vector<8x128xf32>
    %374 = arith.mulf %373, %372 : vector<8x128xf32>
    %cst_169 = arith.constant 5.000000e-01 : f32
    %375 = vector.broadcast %cst_169 : f32 to vector<8x128xf32>
    %376 = arith.addf %374, %375 : vector<8x128xf32>
    %cst_170 = arith.constant 5.000000e-01 : f32
    %377 = vector.broadcast %cst_170 : f32 to vector<8x128xf32>
    %378 = arith.mulf %377, %359 : vector<8x128xf32>
    %379 = math.tanh %378 : vector<8x128xf32>
    %cst_171 = arith.constant 5.000000e-01 : f32
    %380 = vector.broadcast %cst_171 : f32 to vector<8x128xf32>
    %381 = arith.mulf %380, %379 : vector<8x128xf32>
    %cst_172 = arith.constant 5.000000e-01 : f32
    %382 = vector.broadcast %cst_172 : f32 to vector<8x128xf32>
    %383 = arith.addf %381, %382 : vector<8x128xf32>
    %384 = math.tanh %364 : vector<8x128xf32>
    %cst_173 = arith.constant 5.000000e-01 : f32
    %385 = vector.broadcast %cst_173 : f32 to vector<8x128xf32>
    %386 = arith.mulf %385, %369 : vector<8x128xf32>
    %387 = math.tanh %386 : vector<8x128xf32>
    %cst_174 = arith.constant 5.000000e-01 : f32
    %388 = vector.broadcast %cst_174 : f32 to vector<8x128xf32>
    %389 = arith.mulf %388, %387 : vector<8x128xf32>
    %cst_175 = arith.constant 5.000000e-01 : f32
    %390 = vector.broadcast %cst_175 : f32 to vector<8x128xf32>
    %391 = arith.addf %389, %390 : vector<8x128xf32>
    %392 = arith.mulf %383, %346 : vector<8x128xf32>
    %393 = arith.mulf %376, %384 : vector<8x128xf32>
    %394 = arith.addf %392, %393 : vector<8x128xf32>
    %395 = math.tanh %394 : vector<8x128xf32>
    %396 = arith.mulf %391, %395 : vector<8x128xf32>
    %c0_176 = arith.constant 0 : index
    %c0_177 = arith.constant 0 : index
    %397 = vector.load %arg9[%c0_176, %c0_177] : memref<8x128xf32, #tpu.memory_space<vmem>>, vector<8x128xf32>
    tpu.vector_store %arg9[%c0_176, %c0_177], %396 {strides = array<i32>} : memref<8x128xf32, #tpu.memory_space<vmem>>, vector<8x128xf32>,
    %c0_178 = arith.constant 0 : index
    %c0_179 = arith.constant 0 : index
    %398 = vector.load %arg10[%c0_178, %c0_179] : memref<8x128xf32, #tpu.memory_space<vmem>>, vector<8x128xf32>
    tpu.vector_store %arg10[%c0_178, %c0_179], %394 {strides = array<i32>} : memref<8x128xf32, #tpu.memory_space<vmem>>, vector<8x128xf32>,
    %c0_i32_180 = arith.constant 0 : i32
    %399 = arith.cmpi eq, %arg1, %c0_i32_180 : i32
    %400 = arith.extui %399 : i1 to i32
    %c0_i32_181 = arith.constant 0 : i32
    %401 = arith.cmpi ne, %400, %c0_i32_181 : i32
    scf.if %401 {
      %402 = arith.truncf %396 : vector<8x128xf32> to vector<8x128xbf16>
      %c0_182 = arith.constant 0 : index
      %c0_183 = arith.constant 0 : index
      %403 = vector.load %arg6[%c0_182, %c0_183] : memref<128x128xbf16, #tpu.memory_space<vmem>>, vector<128x128xbf16>
      %cst_184 = arith.constant dense<0.000000e+00> : vector<8x128xf32>
      %404 = tpu.matmul %402, %403, %cst_184 {dimension_numbers = #tpu.dot_dimension_numbers<[1], [0], [0], [1], [0, 0, 1, 1], [], []>} : vector<8x128xbf16>, vector<128x128xbf16>, vector<8x128xf32> -> vector<8x128xf32>
      %c0_185 = arith.constant 0 : index
      %c0_186 = arith.constant 0 : index
      %405 = vector.load %arg7[%c0_185, %c0_186] : memref<1x128xf32, #tpu.memory_space<vmem>>, vector<1x128xf32>
      %406 = vector.broadcast %405 : vector<1x128xf32> to vector<8x128xf32>
      %407 = arith.addf %404, %406 : vector<8x128xf32>
      %c0_187 = arith.constant 0 : index
      %c0_188 = arith.constant 0 : index
      %408 = vector.load %arg8[%c0_187, %c0_188] : memref<8x128xf32, #tpu.memory_space<vmem>>, vector<8x128xf32>
      tpu.vector_store %arg8[%c0_187, %c0_188], %407 {strides = array<i32>} : memref<8x128xf32, #tpu.memory_space<vmem>>, vector<8x128xf32>,
    } else {
    }
    return
  }
  func.func @transform_0(%arg0: i32, %arg1: i32) -> (i32, i32, i32) {
    %c0_i32 = arith.constant 0 : i32
    %c0_i32_0 = arith.constant 0 : i32
    return %arg1, %arg0, %c0_i32 : i32, i32, i32
  }
  func.func @transform_1(%arg0: i32, %arg1: i32) -> (i32, i32) {
    %c0_i32 = arith.constant 0 : i32
    %c0_i32_0 = arith.constant 0 : i32
    %c0_i32_1 = arith.constant 0 : i32
    return %c0_i32, %c0_i32_0 : i32, i32
  }
  func.func @transform_2(%arg0: i32, %arg1: i32) -> (i32, i32) {
    %c0_i32 = arith.constant 0 : i32
    %c0_i32_0 = arith.constant 0 : i32
    %c0_i32_1 = arith.constant 0 : i32
    return %c0_i32, %c0_i32_0 : i32, i32
  }
  func.func @transform_3(%arg0: i32, %arg1: i32) -> (i32, i32) {
    %c0_i32 = arith.constant 0 : i32
    %c0_i32_0 = arith.constant 0 : i32
    %c0_i32_1 = arith.constant 0 : i32
    return %c0_i32, %c0_i32_0 : i32, i32
  }
  func.func @transform_4(%arg0: i32, %arg1: i32) -> (i32, i32) {
    %c0_i32 = arith.constant 0 : i32
    %c0_i32_0 = arith.constant 0 : i32
    %c0_i32_1 = arith.constant 0 : i32
    return %c0_i32, %c0_i32_0 : i32, i32
  }
  func.func @transform_5(%arg0: i32, %arg1: i32) -> (i32, i32) {
    %c0_i32 = arith.constant 0 : i32
    %c0_i32_0 = arith.constant 0 : i32
    %c0_i32_1 = arith.constant 0 : i32
    return %c0_i32, %c0_i32_0 : i32, i32
  }
  func.func @transform_6(%arg0: i32, %arg1: i32) -> (i32, i32) {
    %c0_i32 = arith.constant 0 : i32
    %c0_i32_0 = arith.constant 0 : i32
    return %arg0, %c0_i32 : i32, i32
  }
}

</mosaic_0001>

<bundles_post_ra>
// kernel: tpu_custom_call.1
= control target key start
LH: loop header
LB: loop body
LE: loop exit
PB: predicated region body
PF: predicated region fallthrough
CT: control target
= control target key end

     0   :  { %11 = vsyncpa [#allocation5], 0  ;;  %s4468_s0 = inlined_call_operand.hbm [shape: bf16[8,8,8], index: 0, kind: input, shape index: {}]   ;;  %s4469_s1 = inlined_call_operand.hbm [shape: bf16[8,512], index: 1, kind: input, shape index: {}]   ;;  %s4470_s2 = inlined_call_operand.hbm [shape: f32[1,512], index: 2, kind: input, shape index: {}]   ;;  %s4471_s3 = inlined_call_operand.hbm [shape: bf16[128,512], index: 3, kind: input, shape index: {}]   ;;  %s4472_s4 = inlined_call_operand.hbm [shape: bf16[128,128], index: 4, kind: input, shape index: {}]   ;;  %s4473_s5 = inlined_call_operand.vmem [shape: f32[1,128], index: 5, kind: input, shape index: {}]   ;;  %s4474_s6 = inlined_call_operand.hbm [shape: f32[8,128], index: 6, kind: output, shape index: {}]  }
   0x1   :  { %12 = vsyncpa [#allocation8], 0 }
   0x2   :  { %13 = vsyncpa [#allocation11], 0 }
   0x3   :  { %14 = vsyncpa [#allocation6], 0  ;;  %s3504_s21 = smov [#allocation7]   ;;  %s3505_s23 = smov [#allocation10]  }
   0x4   :  { %s33_s22 = sshll.u32 %s3504_s21, 4  ;;  %s52_s24 = sshll.u32 %s3505_s23, 4  ;;  %s34_s22 = int_to_ptr.vmem [resolvable:$true] %s33_s22  ;;  %s53_s24 = int_to_ptr.vmem [resolvable:$true] %s52_s24 }
   0x5   :  { %s3384_s25 = scalar_lea.vmem %s34_s22, 256  ;;  %p3389_p1 = scmp.lt.s32.totalorder %s34_s22, %s34_s22 }
   0x6   :  { %p3385_p0 = scmp.ne.s32.totalorder %s34_s22, %s3384_s25  ;;  %p3390_p2 = scmp.lt.s32.totalorder %s3384_s25, %s3384_s25 }
   0x8   :  { %p3391_p3 = por %p3390_p2, %p3389_p1 }
   0xa   :  { %p3392_p4 = pnand %p3391_p3, %p3385_p0 }
   0xc   :  { %3395 = shalt.err (!%p3392_p4)
}
   0xd   :  { %36 = dma.hbm_to_vmem [thread:$0]  %s4469_s1, 256, %s34_s22, [#allocation8]  }
   0xe   :  { %s3404_s28 = scalar_lea.vmem %s53_s24, 4096  ;;  %p3409_p6 = scmp.lt.s32.totalorder %s53_s24, %s53_s24 }
   0xf   :  { %p3405_p5 = scmp.ne.s32.totalorder %s53_s24, %s3404_s28  ;;  %p3410_p7 = scmp.lt.s32.totalorder %s3404_s28, %s3404_s28 }
  0x11   :  { %p3411_p8 = por %p3410_p7, %p3409_p6 }
  0x13   :  { %p3412_p9 = pnand %p3411_p8, %p3405_p5 }
  0x15   :  { %3415 = shalt.err (!%p3412_p9)
}
  0x16   :  { %s3506_s29 = smov 256   ;;  %s3507_s30 = smov 16  }
  0x17   :  { %58 = dma.hbm_to_vmem [thread:$0]  %s4471_s3, 4096, %s53_s24, [#allocation11], %s3506_s29, %s3506_s29, %s3507_s30  }
  0x18   :  { %s3508_s9 = smov [#allocation4]  }
  0x19   :  { %s20_s10 = sshll.u32 %s3508_s9, 4  ;;  %s21_s10 = int_to_ptr.vmem [resolvable:$true] %s20_s10 }
  0x1a   :  { %s3424_s11 = scalar_lea.vmem %s21_s10, 512  ;;  %p3429_p11 = scmp.lt.s32.totalorder %s21_s10, %s21_s10 }
  0x1b   :  { %p3425_p10 = scmp.ne.s32.totalorder %s21_s10, %s3424_s11  ;;  %p3430_p12 = scmp.lt.s32.totalorder %s3424_s11, %s3424_s11 }
  0x1d   :  { %p3431_p13 = por %p3430_p12, %p3429_p11 }
  0x1f   :  { %p3432_p0 = pnand %p3431_p13, %p3425_p10 }
  0x21   :  { %3435 = shalt.err (!%p3432_p0)
}
  0x22   :  { %s3509_s1 = smov 64   ;;  %s3510_s12 = smov 4  }
  0x23   :  { %26 = dma.hbm_to_vmem [thread:$0]  %s4468_s0, 512, %s21_s10, [#allocation5], %s3509_s1, %s3509_s1, %s3510_s12  }
  0x24   :  { %s3511_s15 = smov [#allocation9]   ;;  %s3512_s3 = smov [#allocation12]  }
  0x25   :  { %s43_s16 = sshll.u32 %s3511_s15, 4  ;;  %s64_s17 = sshll.u32 %s3512_s3, 4  ;;  %s44_s16 = int_to_ptr.vmem [resolvable:$true] %s43_s16  ;;  %s65_s17 = int_to_ptr.vmem [resolvable:$true] %s64_s17 }
  0x26   :  { %s3444_s18 = scalar_lea.vmem %s44_s16, 64  ;;  %p3449_p2 = scmp.lt.s32.totalorder %s44_s16, %s44_s16 }
  0x27   :  { %p3445_p1 = scmp.ne.s32.totalorder %s44_s16, %s3444_s18  ;;  %p3450_p3 = scmp.lt.s32.totalorder %s3444_s18, %s3444_s18 }
  0x29   :  { %p3451_p4 = por %p3450_p3, %p3449_p2 }
  0x2b   :  { %p3452_p5 = pnand %p3451_p4, %p3445_p1 }
  0x2d   :  { %3455 = shalt.err (!%p3452_p5)
}
  0x2e   :  { %46 = dma.hbm_to_vmem [thread:$0]  %s4470_s2, 64, %s44_s16, [#allocation8]  }
  0x2f   :  { %s3464_s21 = scalar_lea.vmem %s65_s17, 1024  ;;  %p3469_p7 = scmp.lt.s32.totalorder %s65_s17, %s65_s17 }
  0x30   :  { %p3465_p6 = scmp.ne.s32.totalorder %s65_s17, %s3464_s21  ;;  %p3470_p8 = scmp.lt.s32.totalorder %s3464_s21, %s3464_s21 }
  0x32   :  { %p3471_p9 = por %p3470_p8, %p3469_p7 }
  0x34   :  { %p3472_p10 = pnand %p3471_p9, %p3465_p6 }
  0x36   :  { %3475 = shalt.err (!%p3472_p10)
}
  0x37   :  { %70 = dma.hbm_to_vmem [thread:$0]  %s4472_s4, 1024, %s65_s17, [#allocation11], %s3509_s1, %s3509_s1, %s3510_s12  }
  0x38   :  { %3496 = dma.done.wait [#allocation5], 512  }
  0x39   :  { %3497 = vsyncadd [#allocation5], 4294966784 }
  0x3a   :  { %3498 = dma.done.wait [#allocation8], 320  }
  0x3b   :  { %3499 = vsyncadd [#allocation8], 4294966976 }
  0x3c   :  { %3500 = dma.done.wait [#allocation11], 5120  }
  0x3d   :  { %3501 = vsyncadd [#allocation11], 4294962176  ;;  %v3513_v0 = vmov 0   ;;  %v103_v1 = vld [vmem:[#allocation7] sm:$0xff]  ;;  %vm170_vm0 = vcmask 1043456   ;;  %v104_v2 = vld [vmem:[#allocation7 + $0x8] sm:$0xff]  ;;  %v107_v47 = vlaneseq }
  0x3e   :  { %215 = vmatprep.mubr.bf16.mxu0 %v3513_v0  ;;  %288 = vmatprep.mubr.bf16.mxu1 %v3513_v0  ;;  %vm157_vm1 = vcmask 64512   ;;  %v2191_v3 = vcombine.high %v103_v1, %v103_v1  ;;  %v2193_v4 = vcombine.high %v104_v2, %v104_v2  ;;  %v2190_v5 = vcombine.low %v103_v1, %v103_v1  ;;  %v3220_v7 = vld [vmem:[#allocation4] sm:$0xff]   ;;  %v3572_v11 = vld [vmem:[#allocation10 + $0xe4] ss:$16 sps:$4 sm:$0xff]   ;;  %v3230_v20 = vld [vmem:[#allocation4 + $0x10] sm:$0xff]   ;;  %s3517_s23 = smov [#allocation13]  }
  0x3f   :  { %v2192_v6 = vcombine.low %v104_v2, %v104_v2  ;;  %v3570_v10 = vld [vmem:[#allocation10 + $0xe0] ss:$16 sps:$4 sm:$0xff]   ;;  %v4475_v12 = vmov 0.0   ;;  %v3582_v14 = vld [vmem:[#allocation10 + $0xc4] ss:$16 sps:$4 sm:$0xff]   ;;  %vm3515_vm2 = vmmov 0  }
  0x40   :  { %2194 = vmatprep.subr.msk.bf16.mxu0 %vm170_vm0, %v2191_v3  ;;  %2199 = vmatprep.subr.msk.bf16.mxu1 %vm170_vm0, %v2193_v4  ;;  %v172_v8 = vsel %vm170_vm0, %v2190_v5, 0  ;;  %v3578_v13 = vld [vmem:[#allocation10 + $0xc0] ss:$16 sps:$4 sm:$0xff]   ;;  %v3225_v15 = vld [vmem:[#allocation4 + $0x8] sm:$0xff]   ;;  %v3235_v25 = vld [vmem:[#allocation4 + $0x18] sm:$0xff]   ;;  %v3516_v34 = vmov 0.0|0.0  }
  0x41   :  { %v178_v9 = vsel %vm170_vm0, %v2192_v6, 0  ;;  %198 = vmatpush1.bf16.msra.mxu0 %v172_v8  ;;  %v3588_v16 = vld [vmem:[#allocation10 + $0xa0] ss:$16 sps:$4 sm:$0xff]   ;;  %v3592_v17 = vld [vmem:[#allocation10 + $0xa4] ss:$16 sps:$4 sm:$0xff]   ;;  %v108_v48 = vshrl.u32 %v107_v47, 7 }
  0x42   :  { %271 = vmatpush1.bf16.msra.mxu1 %v178_v9  ;;  %2542 = vmatprep.subr.bf16.mxu0 %v4475_v12  ;;  %v3598_v18 = vld [vmem:[#allocation10 + $0x80] ss:$16 sps:$4 sm:$0xff]   ;;  %v3602_v19 = vld [vmem:[#allocation10 + $0x84] ss:$16 sps:$4 sm:$0xff]   ;;  %v3650_v30 = vld [vmem:[#allocation10 + $0xe8] ss:$16 sps:$4 sm:$0xff]  }
  0x43   :  { %2562 = vmatprep.subr.bf16.mxu1 %v4475_v12  ;;  %v3608_v21 = vld [vmem:[#allocation10 + $0x60] ss:$16 sps:$4 sm:$0xff]   ;;  %v3612_v22 = vld [vmem:[#allocation10 + $0x64] ss:$16 sps:$4 sm:$0xff]   ;;  %v3654_v31 = vld [vmem:[#allocation10 + $0xec] ss:$16 sps:$4 sm:$0xff]  }
  0x44   :  { %2195 = vmatmul.mubr.msk.bf16.vlgmr.msra.gmra.mxu0 %vm157_vm1, %v3220_v7  ;;  %v3618_v23 = vld [vmem:[#allocation10 + $0x40] ss:$16 sps:$4 sm:$0xff]   ;;  %v3622_v24 = vld [vmem:[#allocation10 + $0x44] ss:$16 sps:$4 sm:$0xff]   ;;  %v3658_v32 = vld [vmem:[#allocation10 + $0xc8] ss:$16 sps:$4 sm:$0xff]  }
  0x45   :  { %2200 = vmatmul.mubr.msk.bf16.vlgmr.msra.gmra.mxu1 %vm157_vm1, %v3220_v7  ;;  %2543 = vmatpush3.bf16.msra.mxu0 %v3570_v10  ;;  %v3628_v26 = vld [vmem:[#allocation10 + $0x20] ss:$16 sps:$4 sm:$0xff]   ;;  %v3632_v27 = vld [vmem:[#allocation10 + $0x24] ss:$16 sps:$4 sm:$0xff]   ;;  %v3660_v33 = vld [vmem:[#allocation10 + $0xcc] ss:$16 sps:$4 sm:$0xff]  }
  0x46   :  { %2563 = vmatpush3.bf16.msra.mxu1 %v3572_v11  ;;  %2544 = vmatprep.subr.bf16.mxu0 %v4475_v12  ;;  %v3638_v28 = vld [vmem:[#allocation10] ss:$16 sps:$4 sm:$0xff]   ;;  %v3642_v29 = vld [vmem:[#allocation10 + $0x4] ss:$16 sps:$4 sm:$0xff]   ;;  %v3672_v35 = vld [vmem:[#allocation10 + $0xa8] ss:$16 sps:$4 sm:$0xff]  }
  0x47   :  { %2564 = vmatprep.subr.bf16.mxu1 %v4475_v12  ;;  %225 = vmatprep.mubr.bf16.mxu0 %v3513_v0  ;;  %v3674_v36 = vld [vmem:[#allocation10 + $0xac] ss:$16 sps:$4 sm:$0xff]   ;;  %v3680_v37 = vld [vmem:[#allocation10 + $0x88] ss:$16 sps:$4 sm:$0xff]   ;;  %v117_v49 = vsub.s32 2, %v108_v48  ;;  %v109_v50 = vsub.s32 0, %v108_v48 }
  0x48   :  { %298 = vmatprep.mubr.bf16.mxu1 %v3513_v0  ;;  %v3682_v38 = vld [vmem:[#allocation10 + $0x8c] ss:$16 sps:$4 sm:$0xff]   ;;  %v3688_v39 = vld [vmem:[#allocation10 + $0x68] ss:$16 sps:$4 sm:$0xff]   ;;  %v121_v51 = vsub.s32 3, %v108_v48  ;;  %v113_v56 = vsub.s32 1, %v108_v48 }
  0x49   :  { %2545 = vmatpush3.bf16.msra.mxu0 %v3578_v13  ;;  %v3690_v40 = vld [vmem:[#allocation10 + $0x6c] ss:$16 sps:$4 sm:$0xff]   ;;  %v3696_v41 = vld [vmem:[#allocation10 + $0x48] ss:$16 sps:$4 sm:$0xff]   ;;  %s2175_s24 = sshll.u32 %s3517_s23, 4  ;;  %s2176_s24 = int_to_ptr.vmem [resolvable:$true] %s2175_s24 }
  0x4a   :  { %2565 = vmatpush3.bf16.msra.mxu1 %v3582_v14  ;;  %2546 = vmatprep.subr.bf16.mxu0 %v4475_v12  ;;  %v3698_v42 = vld [vmem:[#allocation10 + $0x4c] ss:$16 sps:$4 sm:$0xff]   ;;  %v3704_v43 = vld [vmem:[#allocation10 + $0x28] ss:$16 sps:$4 sm:$0xff]   ;;  %s3476_s25 = scalar_lea.vmem %s2176_s24, 128  ;;  %p3481_p12 = scmp.lt.s32.totalorder %s2176_s24, %s2176_s24 }
  0x4b   :  { %2566 = vmatprep.subr.bf16.mxu1 %v4475_v12  ;;  %v3706_v44 = vld [vmem:[#allocation10 + $0x2c] ss:$16 sps:$4 sm:$0xff]   ;;  %v3712_v45 = vld [vmem:[#allocation10 + $0x8] ss:$16 sps:$4 sm:$0xff]   ;;  %p3477_p11 = scmp.ne.s32.totalorder %s2176_s24, %s3476_s25  ;;  %p3482_p13 = scmp.lt.s32.totalorder %s3476_s25, %s3476_s25 }
  0x4c   :  { %2196 = vmatmul.mubr.msk.bf16.gmra.mxu0 %vm157_vm1, %v3225_v15  ;;  %v3714_v46 = vld [vmem:[#allocation10 + $0xc] ss:$16 sps:$4 sm:$0xff]  }
  0x4d   :  { %2201 = vmatmul.mubr.msk.bf16.gmra.mxu1 %vm157_vm1, %v3225_v15  ;;  %2547 = vmatpush3.bf16.msra.mxu0 %v3588_v16  ;;  %v105_v52 = vld [vmem:[#allocation9] sm:$0xf]  ;;  %p3483_p0 = por %p3482_p13, %p3481_p12 }
  0x4e   :  { %2567 = vmatpush3.bf16.msra.mxu1 %v3592_v17  ;;  %2548 = vmatprep.subr.bf16.mxu0 %v4475_v12  ;;  %v3762_v55 = vrot.slane %v105_v52, %v117_v49  ;;  %v3768_v59 = vrot.slane %v105_v52, %v109_v50  ;;  %v3770_v60 = vrot.slane %v105_v52, %v121_v51 }
  0x4f   :  { %2568 = vmatprep.subr.bf16.mxu1 %v4475_v12  ;;  %235 = vmatprep.mubr.bf16.mxu0 %v3513_v0  ;;  %v3772_v63 = vrot.slane %v105_v52, %v113_v56  ;;  %p3484_p1 = pnand %p3483_p0, %p3477_p11 }
  0x50   :  { %308 = vmatprep.mubr.bf16.mxu1 %v3513_v0 }
  0x51   :  { %2549 = vmatpush3.bf16.msra.mxu0 %v3598_v18 }
  0x52   :  { %2569 = vmatpush3.bf16.msra.mxu1 %v3602_v19  ;;  %2550 = vmatprep.subr.bf16.mxu0 %v4475_v12 }
  0x53   :  { %2570 = vmatprep.subr.bf16.mxu1 %v4475_v12 }
  0x54   :  { %2197 = vmatmul.mubr.msk.bf16.gmra.mxu0 %vm157_vm1, %v3230_v20 }
  0x55   :  { %2202 = vmatmul.mubr.msk.bf16.gmra.mxu1 %vm157_vm1, %v3230_v20  ;;  %2551 = vmatpush3.bf16.msra.mxu0 %v3608_v21 }
  0x56   :  { %2571 = vmatpush3.bf16.msra.mxu1 %v3612_v22  ;;  %2552 = vmatprep.subr.bf16.mxu0 %v4475_v12 }
  0x57   :  { %2572 = vmatprep.subr.bf16.mxu1 %v4475_v12  ;;  %245 = vmatprep.mubr.bf16.mxu0 %v3513_v0 }
  0x58   :  { %318 = vmatprep.mubr.bf16.mxu1 %v3513_v0 }
  0x59   :  { %2553 = vmatpush3.bf16.msra.mxu0 %v3618_v23 }
  0x5a   :  { %2573 = vmatpush3.bf16.msra.mxu1 %v3622_v24  ;;  %2554 = vmatprep.subr.bf16.mxu0 %v4475_v12 }
  0x5b   :  { %2574 = vmatprep.subr.bf16.mxu1 %v4475_v12 }
  0x5c   :  { %2198 = vmatmul.mubr.msk.bf16.gmra.mxu0 %vm157_vm1, %v3235_v25 }
  0x5d   :  { %2203 = vmatmul.mubr.msk.bf16.gmra.mxu1 %vm157_vm1, %v3235_v25  ;;  %2555 = vmatpush3.bf16.msra.mxu0 %v3628_v26 }
  0x5e   :  { %2575 = vmatpush3.bf16.msra.mxu1 %v3632_v27  ;;  %2556 = vmatprep.subr.bf16.mxu0 %v4475_v12 }
  0x5f   :  { %2576 = vmatprep.subr.bf16.mxu1 %v4475_v12  ;;  %2558 = vmatprep.mubr.msk.bf16.mxu0 %vm3515_vm2, %v4475_v12 }
  0x60   :  { %2578 = vmatprep.mubr.msk.bf16.mxu1 %vm3515_vm2, %v4475_v12 }
  0x61   :  { %2557 = vmatpush3.bf16.msra.mxu0 %v3638_v28 }
  0x62   :  { %2577 = vmatpush3.bf16.msra.mxu1 %v3642_v29  ;;  %2582 = vmatprep.subr.bf16.mxu0 %v4475_v12 }
  0x63   :  { %2602 = vmatprep.subr.bf16.mxu1 %v4475_v12 }
  0x64   :  { %2559 = vmatmul.mubr.bf16.vlgmr.msra.gmra.mxu0 %v3516_v34 }
  0x65   :  { %2579 = vmatmul.mubr.bf16.vlgmr.msra.gmra.mxu1 %v3516_v34  ;;  %2583 = vmatpush3.bf16.msra.mxu0 %v3650_v30 }
  0x66   :  { %2603 = vmatpush3.bf16.msra.mxu1 %v3654_v31  ;;  %2584 = vmatprep.subr.bf16.mxu0 %v4475_v12 }
  0x67   :  { %2604 = vmatprep.subr.bf16.mxu1 %v4475_v12  ;;  %2598 = vmatprep.mubr.msk.bf16.mxu0 %vm3515_vm2, %v4475_v12 }
  0x68   :  { %2618 = vmatprep.mubr.msk.bf16.mxu1 %vm3515_vm2, %v4475_v12 }
  0x69   :  { %2585 = vmatpush3.bf16.msra.mxu0 %v3658_v32 }
  0x6a   :  { %2605 = vmatpush3.bf16.msra.mxu1 %v3660_v33  ;;  %2586 = vmatprep.subr.bf16.mxu0 %v4475_v12 }
  0x6b   :  { %2606 = vmatprep.subr.bf16.mxu1 %v4475_v12 }
  0x6d   :  { %2587 = vmatpush3.bf16.msra.mxu0 %v3672_v35 }
  0x6e   :  { %2607 = vmatpush3.bf16.msra.mxu1 %v3674_v36  ;;  %2588 = vmatprep.subr.bf16.mxu0 %v4475_v12 }
  0x6f   :  { %2608 = vmatprep.subr.bf16.mxu1 %v4475_v12 }
  0x71   :  { %2589 = vmatpush3.bf16.msra.mxu0 %v3680_v37 }
  0x72   :  { %2609 = vmatpush3.bf16.msra.mxu1 %v3682_v38  ;;  %2590 = vmatprep.subr.bf16.mxu0 %v4475_v12 }
  0x73   :  { %2610 = vmatprep.subr.bf16.mxu1 %v4475_v12 }
  0x75   :  { %2591 = vmatpush3.bf16.msra.mxu0 %v3688_v39 }
  0x76   :  { %2611 = vmatpush3.bf16.msra.mxu1 %v3690_v40  ;;  %2592 = vmatprep.subr.bf16.mxu0 %v4475_v12 }
  0x77   :  { %2612 = vmatprep.subr.bf16.mxu1 %v4475_v12 }
  0x79   :  { %2593 = vmatpush3.bf16.msra.mxu0 %v3696_v41 }
  0x7a   :  { %2613 = vmatpush3.bf16.msra.mxu1 %v3698_v42  ;;  %2594 = vmatprep.subr.bf16.mxu0 %v4475_v12 }
  0x7b   :  { %2614 = vmatprep.subr.bf16.mxu1 %v4475_v12 }
  0x7d   :  { %2595 = vmatpush3.bf16.msra.mxu0 %v3704_v43 }
  0x7e   :  { %2615 = vmatpush3.bf16.msra.mxu1 %v3706_v44  ;;  %2596 = vmatprep.subr.bf16.mxu0 %v4475_v12 }
  0x7f   :  { %2616 = vmatprep.subr.bf16.mxu1 %v4475_v12 }
  0x81   :  { %2597 = vmatpush3.bf16.msra.mxu0 %v3712_v45 }
  0x82   :  { %2617 = vmatpush3.bf16.msra.mxu1 %v3714_v46  ;;  %2622 = vmatprep.subr.bf16.mxu0 %v4475_v12 }
  0x83   :  { %2642 = vmatprep.subr.bf16.mxu1 %v4475_v12 }
  0x84   :  { %2599 = vmatmul.mubr.bf16.vlgmr.msra.gmra.mxu0 %v3516_v34 }
  0x85   :  { %2619 = vmatmul.mubr.bf16.vlgmr.msra.gmra.mxu1 %v3516_v34  ;;  %2623 = vmatpush3.bf16.msra.mxu0 %v3570_v10 }
  0x86   :  { %2643 = vmatpush3.bf16.msra.mxu1 %v3572_v11  ;;  %2624 = vmatprep.subr.bf16.mxu0 %v4475_v12 }
  0x87   :  { %2644 = vmatprep.subr.bf16.mxu1 %v4475_v12  ;;  %2638 = vmatprep.mubr.msk.bf16.mxu0 %vm3515_vm2, %v4475_v12 }
  0x88   :  { %2658 = vmatprep.mubr.msk.bf16.mxu1 %vm3515_vm2, %v4475_v12 }
  0x89   :  { %2625 = vmatpush3.bf16.msra.mxu0 %v3578_v13 }
  0x8a   :  { %2645 = vmatpush3.bf16.msra.mxu1 %v3582_v14  ;;  %2626 = vmatprep.subr.bf16.mxu0 %v4475_v12 }
  0x8b   :  { %2646 = vmatprep.subr.bf16.mxu1 %v4475_v12 }
  0x8d   :  { %2627 = vmatpush3.bf16.msra.mxu0 %v3588_v16 }
  0x8e   :  { %2647 = vmatpush3.bf16.msra.mxu1 %v3592_v17  ;;  %2628 = vmatprep.subr.bf16.mxu0 %v4475_v12 }
  0x8f   :  { %2648 = vmatprep.subr.bf16.mxu1 %v4475_v12 }
  0x91   :  { %2629 = vmatpush3.bf16.msra.mxu0 %v3598_v18 }
  0x92   :  { %2649 = vmatpush3.bf16.msra.mxu1 %v3602_v19  ;;  %2630 = vmatprep.subr.bf16.mxu0 %v4475_v12 }
  0x93   :  { %2650 = vmatprep.subr.bf16.mxu1 %v4475_v12 }
  0x95   :  { %2631 = vmatpush3.bf16.msra.mxu0 %v3608_v21 }
  0x96   :  { %2651 = vmatpush3.bf16.msra.mxu1 %v3612_v22  ;;  %2632 = vmatprep.subr.bf16.mxu0 %v4475_v12 }
  0x97   :  { %2652 = vmatprep.subr.bf16.mxu1 %v4475_v12 }
  0x99   :  { %2633 = vmatpush3.bf16.msra.mxu0 %v3618_v23 }
  0x9a   :  { %2653 = vmatpush3.bf16.msra.mxu1 %v3622_v24  ;;  %2634 = vmatprep.subr.bf16.mxu0 %v4475_v12 }
  0x9b   :  { %2654 = vmatprep.subr.bf16.mxu1 %v4475_v12 }
  0x9d   :  { %2635 = vmatpush3.bf16.msra.mxu0 %v3628_v26 }
  0x9e   :  { %2655 = vmatpush3.bf16.msra.mxu1 %v3632_v27  ;;  %2636 = vmatprep.subr.bf16.mxu0 %v4475_v12 }
  0x9f   :  { %2656 = vmatprep.subr.bf16.mxu1 %v4475_v12 }
  0xa1   :  { %2637 = vmatpush3.bf16.msra.mxu0 %v3638_v28 }
  0xa2   :  { %2657 = vmatpush3.bf16.msra.mxu1 %v3642_v29  ;;  %2662 = vmatprep.subr.bf16.mxu0 %v4475_v12 }
  0xa3   :  { %2682 = vmatprep.subr.bf16.mxu1 %v4475_v12 }
 0x104   :  { %v3758_v53 = vpop.f32.mrf.mxu0 }
 0x105   :  { %v3760_v54 = vpop.f32.mrf.mxu1 }
 0x106   :  { %v3764_v57 = vpop.f32.mrf.mxu0 }
 0x107   :  { %v3766_v58 = vpop.f32.mrf.mxu1 }
 0x108   :  { %v221_v61 = vpop.f32.mrf.mxu0 }
 0x109   :  { %v294_v62 = vpop.f32.mrf.mxu1  ;;  %v3775_v0 = vadd.f32 %v221_v61, %v3768_v59 }
 0x10a   :  { %v3778_v1 = vadd.f32 %v294_v62, %v3762_v55  ;;  %v223_v2 = vpop.f32.mrf.mxu0 }
 0x10b   :  { %v296_v3 = vpop.f32.mrf.mxu1  ;;  %v3781_v4 = vadd.f32 %v223_v2, %v3772_v63 }
 0x10c   :  { %v3784_v5 = vadd.f32 %v296_v3, %v3770_v60  ;;  %v227_v6 = vpop.f32.mrf.mxu0 }
 0x10d   :  { %v300_v7 = vpop.f32.mrf.mxu1  ;;  %v3787_v8 = vadd.f32 %v227_v6, %v3768_v59 }
 0x10e   :  { %v3790_v9 = vadd.f32 %v300_v7, %v3762_v55  ;;  %v229_v15 = vpop.f32.mrf.mxu0 }
 0x10f   :  { %v302_v20 = vpop.f32.mrf.mxu1  ;;  %v3793_v25 = vadd.f32 %v229_v15, %v3772_v63 }
 0x110   :  { %v3796_v34 = vadd.f32 %v302_v20, %v3770_v60  ;;  %v231_v47 = vpop.f32.mrf.mxu0 }
 0x111   :  { %v304_v48 = vpop.f32.mrf.mxu1  ;;  %v3799_v49 = vadd.f32 %v231_v47, %v3768_v59 }
 0x112   :  { %v3802_v50 = vadd.f32 %v304_v48, %v3762_v55  ;;  %v233_v51 = vpop.f32.mrf.mxu0 }
 0x113   :  { %4477 = vst [vmem:[#allocation18_spill] sm:$0xff] %v3799_v49  ;;  %v306_v52 = vpop.f32.mrf.mxu1  ;;  %v3805_v56 = vadd.f32 %v233_v51, %v3772_v63 }
 0x114   :  { %4478 = vst [vmem:[#allocation19_spill] sm:$0xff] %v3802_v50  ;;  %v3808_v61 = vadd.f32 %v306_v52, %v3770_v60  ;;  %v237_v62 = vpop.f32.mrf.mxu0 }
 0x115   :  { %4479 = vst [vmem:[#allocation20_spill] sm:$0xff] %v3805_v56  ;;  %v310_v2 = vpop.f32.mrf.mxu1  ;;  %v3811_v3 = vadd.f32 %v237_v62, %v3768_v59 }
 0x116   :  { %4480 = vst [vmem:[#allocation21_spill] sm:$0xff] %v3808_v61  ;;  %v3814_v6 = vadd.f32 %v310_v2, %v3762_v55  ;;  %v239_v7 = vpop.f32.mrf.mxu0 }
 0x117   :  { %4481 = vst [vmem:[#allocation22_spill] sm:$0xff] %v3811_v3  ;;  %v312_v15 = vpop.f32.mrf.mxu1  ;;  %v3817_v20 = vadd.f32 %v239_v7, %v3772_v63 }
 0x118   :  { %4482 = vst [vmem:[#allocation23_spill] sm:$0xff] %v3814_v6  ;;  %v3820_v47 = vadd.f32 %v312_v15, %v3770_v60  ;;  %v241_v48 = vpop.f32.mrf.mxu0 }
 0x119   :  { %4483 = vst [vmem:[#allocation24_spill] sm:$0xff] %v3817_v20  ;;  %v314_v51 = vpop.f32.mrf.mxu1  ;;  %v3823_v52 = vadd.f32 %v241_v48, %v3768_v59 }
 0x11a   :  { %4484 = vst [vmem:[#allocation25_spill] sm:$0xff] %v3820_v47  ;;  %v3826_v12 = vadd.f32 %v314_v51, %v3762_v55  ;;  %v243_v62 = vpop.f32.mrf.mxu0 }
 0x11b   :  { %4485 = vst [vmem:[#allocation26_spill] sm:$0xff] %v3823_v52  ;;  %v316_v3 = vpop.f32.mrf.mxu1  ;;  %v3829_v2 = vadd.f32 %v243_v62, %v3772_v63 }
 0x11c   :  { %4486 = vst [vmem:[#allocation27_spill] sm:$0xff] %v3826_v12  ;;  %v3832_v6 = vadd.f32 %v316_v3, %v3770_v60  ;;  %v247_v7 = vpop.f32.mrf.mxu0 }
 0x11d   :  { %4487 = vst [vmem:[#allocation28_spill] sm:$0xff] %v3829_v2  ;;  %v320_v20 = vpop.f32.mrf.mxu1  ;;  %v3835_v15 = vadd.f32 %v247_v7, %v3768_v59 }
 0x11e   :  { %4488 = vst [vmem:[#allocation29_spill] sm:$0xff] %v3832_v6  ;;  %v3838_v47 = vadd.f32 %v320_v20, %v3762_v55  ;;  %v249_v48 = vpop.f32.mrf.mxu0 }
 0x11f   :  { %4489 = vst [vmem:[#allocation30_spill] sm:$0xff] %v3835_v15  ;;  %v322_v52 = vpop.f32.mrf.mxu1  ;;  %v3841_v51 = vadd.f32 %v249_v48, %v3772_v63 }
 0x120   :  { %4490 = vst [vmem:[#allocation31_spill] sm:$0xff] %v3838_v47  ;;  %v3844_v12 = vadd.f32 %v322_v52, %v3770_v60  ;;  %v251_v62 = vpop.f32.mrf.mxu0 }
 0x121   :  { %4491 = vst [vmem:[#allocation32_spill] sm:$0xff] %v3841_v51  ;;  %v324_v2 = vpop.f32.mrf.mxu1  ;;  %v3847_v3 = vadd.f32 %v251_v62, %v3768_v59 }
 0x122   :  { %4492 = vst [vmem:[#allocation33_spill] sm:$0xff] %v3844_v12  ;;  %v3850_v6 = vadd.f32 %v324_v2, %v3762_v55  ;;  %v253_v7 = vpop.f32.mrf.mxu0  ;;  %v220_v2 = vadd.f32 %v3764_v57, %v3772_v63  ;;  %v293_v57 = vadd.f32 %v3766_v58, %v3770_v60 }
 0x123   :  { %4493 = vst [vmem:[#allocation34_spill] sm:$0xff] %v3847_v3  ;;  %v326_v15 = vpop.f32.mrf.mxu1  ;;  %v3853_v20 = vadd.f32 %v253_v7, %v3772_v63 }
 0x124   :  { %4494 = vst [vmem:[#allocation35_spill] sm:$0xff] %v3850_v6  ;;  %v3856_v47 = vadd.f32 %v326_v15, %v3770_v60  ;;  %v430_v48 = vpop.f32.mrf.mxu0  ;;  %v218_v6 = vadd.f32 %v3758_v53, %v3768_v59  ;;  %v291_v15 = vadd.f32 %v3760_v54, %v3762_v55 }
 0x125   :  { %4495 = vst [vmem:[#allocation36_spill] sm:$0xff] %v3853_v20  ;;  %v535_v51 = vpop.f32.mrf.mxu1 }
 0x126   :  { %v2560_v52 = vpop.f32.mrf.mxu0  ;;  %v541_v3 = vadd.f32 %v535_v51, %v220_v2  ;;  %v436_v7 = vadd.f32 %v430_v48, %v218_v6 }
 0x127   :  { %v2580_v12 = vpop.f32.mrf.mxu1 }
 0x128   :  { %v433_v61 = vpop.f32.mrf.mxu0  ;;  %v756_v20 = vmul.f32 0.5, %v541_v3  ;;  %v752_v56 = vmul.f32 0.5, %v436_v7 }
 0x129   :  { %v538_v50 = vpop.f32.mrf.mxu1 }
 0x12a   :  { %v2561_v49 = vpop.f32.mrf.mxu0  ;;  %3264 = vtanh.f32 %v756_v20 }
 0x12b   :  { %v2581_v62 = vpop.f32.mrf.mxu1  ;;  %3266 = vtanh.f32 %v752_v56 }
 0x137   :  { %v3265_v6 = vpop.eup %3264 }
 0x138   :  { %v3267_v20 = vpop.eup %3266  ;;  %v758_v56 = vmul.f32 0.5, %v3265_v6 }
 0x139   :  { %v754_v62 = vmul.f32 0.5, %v3267_v20 }
 0x13a   :  { %v759_v54 = vadd.f32 0.5, %v758_v56 }
 0x13b   :  { %v755_v55 = vadd.f32 0.5, %v754_v62 }
 0x13c   :  { %v765_v7 = vmul.f32 0.0, %v759_v54 }
 0x144   :  { %v640_v12 = vpop.f32.mrf.mxu0 }
 0x145   :  { %v745_v61 = vpop.f32.mrf.mxu1  ;;  %v646_v50 = vadd.f32 %v640_v12, %v291_v15 }
 0x146   :  { %v2600_v49 = vpop.f32.mrf.mxu0  ;;  %v751_v59 = vadd.f32 %v745_v61, %v293_v57  ;;  %v4496_v57 = vmov 0.0  }
 0x147   :  { %v2620_v52 = vpop.f32.mrf.mxu1  ;;  %3268 = vtanh.f32 %v646_v50 }
 0x148   :  { %v643_v63 = vpop.f32.mrf.mxu0  ;;  %v761_v48 = vmul.f32 0.5, %v751_v59 }
 0x149   :  { %v748_v53 = vpop.f32.mrf.mxu1 }
 0x14a   :  { %v2601_v51 = vpop.f32.mrf.mxu0  ;;  %3270 = vtanh.f32 %v761_v48 }
 0x14b   :  { %v2621_v3 = vpop.f32.mrf.mxu1 }
 0x154   :  { %v3269_v2 = vpop.eup %3268 }
 0x155   :  { %v766_v15 = vmul.f32 %v3269_v2, %v755_v55 }
 0x157   :  { %v3866_v12 = vadd.f32 %v766_v15, %v765_v7  ;;  %v3271_v58 = vpop.eup %3270 }
 0x158   :  { %v763_v60 = vmul.f32 0.5, %v3271_v58 }
 0x159   :  { %3272 = vtanh.f32 %v3866_v12 }
 0x15a   :  { %v764_v61 = vadd.f32 0.5, %v763_v60 }
 0x166   :  { %v3273_v50 = vpop.eup %3272 }
 0x167   :  { %v769_v49 = vmul.f32 %v3273_v50, %v764_v61 }
 0x169   :  { %v770_v52 = vpack.c.bf16 %v769_v49, %v769_v49 }
 0x16b   :  { %2639 = vmatmul.mubr.bf16.vlgmr.msra.gmra.mxu0 %v770_v52  ;;  %2659 = vmatmul.mubr.bf16.vlgmr.msra.gmra.mxu1 %v770_v52 }
 0x16c   :  { %2663 = vmatpush3.bf16.msra.mxu0 %v3650_v30  ;;  %2683 = vmatpush3.bf16.msra.mxu1 %v3654_v31 }
 0x16d   :  { %2664 = vmatprep.subr.bf16.mxu0 %v4496_v57  ;;  %2684 = vmatprep.subr.bf16.mxu1 %v4496_v57 }
 0x16e   :  { %2678 = vmatprep.mubr.msk.bf16.mxu0 %vm3515_vm2, %v4496_v57  ;;  %2698 = vmatprep.mubr.msk.bf16.mxu1 %vm3515_vm2, %v4496_v57 }
 0x170   :  { %2665 = vmatpush3.bf16.msra.mxu0 %v3658_v32  ;;  %2685 = vmatpush3.bf16.msra.mxu1 %v3660_v33 }
 0x171   :  { %2666 = vmatprep.subr.bf16.mxu0 %v4496_v57  ;;  %2686 = vmatprep.subr.bf16.mxu1 %v4496_v57 }
 0x174   :  { %2667 = vmatpush3.bf16.msra.mxu0 %v3672_v35  ;;  %2687 = vmatpush3.bf16.msra.mxu1 %v3674_v36 }
 0x175   :  { %2668 = vmatprep.subr.bf16.mxu0 %v4496_v57  ;;  %2688 = vmatprep.subr.bf16.mxu1 %v4496_v57 }
 0x178   :  { %2669 = vmatpush3.bf16.msra.mxu0 %v3680_v37  ;;  %2689 = vmatpush3.bf16.msra.mxu1 %v3682_v38 }
 0x179   :  { %2670 = vmatprep.subr.bf16.mxu0 %v4496_v57  ;;  %2690 = vmatprep.subr.bf16.mxu1 %v4496_v57 }
 0x17c   :  { %2671 = vmatpush3.bf16.msra.mxu0 %v3688_v39  ;;  %2691 = vmatpush3.bf16.msra.mxu1 %v3690_v40 }
 0x17d   :  { %2672 = vmatprep.subr.bf16.mxu0 %v4496_v57  ;;  %2692 = vmatprep.subr.bf16.mxu1 %v4496_v57 }
 0x180   :  { %2673 = vmatpush3.bf16.msra.mxu0 %v3696_v41  ;;  %2693 = vmatpush3.bf16.msra.mxu1 %v3698_v42 }
 0x181   :  { %2674 = vmatprep.subr.bf16.mxu0 %v4496_v57  ;;  %2694 = vmatprep.subr.bf16.mxu1 %v4496_v57 }
 0x184   :  { %2675 = vmatpush3.bf16.msra.mxu0 %v3704_v43  ;;  %2695 = vmatpush3.bf16.msra.mxu1 %v3706_v44 }
 0x185   :  { %2676 = vmatprep.subr.bf16.mxu0 %v4496_v57  ;;  %2696 = vmatprep.subr.bf16.mxu1 %v4496_v57 }
 0x188   :  { %2677 = vmatpush3.bf16.msra.mxu0 %v3712_v45  ;;  %2697 = vmatpush3.bf16.msra.mxu1 %v3714_v46 }
 0x189   :  { %2702 = vmatprep.subr.bf16.mxu0 %v4496_v57  ;;  %2722 = vmatprep.subr.bf16.mxu1 %v4496_v57 }
 0x18b   :  { %2679 = vmatmul.mubr.bf16.vlgmr.msra.gmra.mxu0 %v770_v52  ;;  %2699 = vmatmul.mubr.bf16.vlgmr.msra.gmra.mxu1 %v770_v52 }
 0x18c   :  { %2703 = vmatpush3.bf16.msra.mxu0 %v3570_v10  ;;  %2723 = vmatpush3.bf16.msra.mxu1 %v3572_v11 }
 0x18d   :  { %2704 = vmatprep.subr.bf16.mxu0 %v4496_v57  ;;  %2724 = vmatprep.subr.bf16.mxu1 %v4496_v57 }
 0x18e   :  { %2718 = vmatprep.mubr.msk.bf16.mxu0 %vm3515_vm2, %v4496_v57  ;;  %2738 = vmatprep.mubr.msk.bf16.mxu1 %vm3515_vm2, %v4496_v57 }
 0x190   :  { %2705 = vmatpush3.bf16.msra.mxu0 %v3578_v13  ;;  %2725 = vmatpush3.bf16.msra.mxu1 %v3582_v14 }
 0x191   :  { %2706 = vmatprep.subr.bf16.mxu0 %v4496_v57  ;;  %2726 = vmatprep.subr.bf16.mxu1 %v4496_v57 }
 0x194   :  { %2707 = vmatpush3.bf16.msra.mxu0 %v3588_v16  ;;  %2727 = vmatpush3.bf16.msra.mxu1 %v3592_v17 }
 0x195   :  { %2708 = vmatprep.subr.bf16.mxu0 %v4496_v57  ;;  %2728 = vmatprep.subr.bf16.mxu1 %v4496_v57 }
 0x198   :  { %2709 = vmatpush3.bf16.msra.mxu0 %v3598_v18  ;;  %2729 = vmatpush3.bf16.msra.mxu1 %v3602_v19 }
 0x199   :  { %2710 = vmatprep.subr.bf16.mxu0 %v4496_v57  ;;  %2730 = vmatprep.subr.bf16.mxu1 %v4496_v57 }
 0x19c   :  { %2711 = vmatpush3.bf16.msra.mxu0 %v3608_v21  ;;  %2731 = vmatpush3.bf16.msra.mxu1 %v3612_v22 }
 0x19d   :  { %2712 = vmatprep.subr.bf16.mxu0 %v4496_v57  ;;  %2732 = vmatprep.subr.bf16.mxu1 %v4496_v57 }
 0x1a0   :  { %2713 = vmatpush3.bf16.msra.mxu0 %v3618_v23  ;;  %2733 = vmatpush3.bf16.msra.mxu1 %v3622_v24 }
 0x1a1   :  { %2714 = vmatprep.subr.bf16.mxu0 %v4496_v57  ;;  %2734 = vmatprep.subr.bf16.mxu1 %v4496_v57 }
 0x1a4   :  { %2715 = vmatpush3.bf16.msra.mxu0 %v3628_v26  ;;  %2735 = vmatpush3.bf16.msra.mxu1 %v3632_v27 }
 0x1a5   :  { %2716 = vmatprep.subr.bf16.mxu0 %v4496_v57  ;;  %2736 = vmatprep.subr.bf16.mxu1 %v4496_v57 }
 0x1a8   :  { %2717 = vmatpush3.bf16.msra.mxu0 %v3638_v28  ;;  %2737 = vmatpush3.bf16.msra.mxu1 %v3642_v29 }
 0x1a9   :  { %2742 = vmatprep.subr.bf16.mxu0 %v4496_v57  ;;  %2762 = vmatprep.subr.bf16.mxu1 %v4496_v57 }
 0x22b   :  { %v805_v10 = vpop.f32.mrf.mxu0  ;;  %v846_v11 = vpop.f32.mrf.mxu1 }
 0x22c   :  { %v852_v20 = vadd.f32 %v846_v11, %v3781_v4  ;;  %v811_v56 = vadd.f32 %v805_v10, %v3775_v0 }
 0x22d   :  { %v2640_v63 = vpop.f32.mrf.mxu0  ;;  %v2660_v53 = vpop.f32.mrf.mxu1 }
 0x22e   :  { %v939_v48 = vmul.f32 0.5, %v852_v20  ;;  %v935_v62 = vmul.f32 0.5, %v811_v56 }
 0x22f   :  { %v808_v59 = vpop.f32.mrf.mxu0  ;;  %v849_v6 = vpop.f32.mrf.mxu1 }
 0x230   :  { %3274 = vtanh.f32 %v939_v48 }
 0x231   :  { %v2641_v51 = vpop.f32.mrf.mxu0  ;;  %v2661_v3 = vpop.f32.mrf.mxu1  ;;  %3276 = vtanh.f32 %v935_v62 }
 0x23d   :  { %v3275_v50 = vpop.eup %3274 }
 0x23e   :  { %v3277_v52 = vpop.eup %3276  ;;  %v941_v0 = vmul.f32 0.5, %v3275_v50 }
 0x23f   :  { %v937_v11 = vmul.f32 0.5, %v3277_v52 }
 0x240   :  { %v942_v63 = vadd.f32 0.5, %v941_v0 }
 0x241   :  { %v938_v53 = vadd.f32 0.5, %v937_v11 }
 0x24b   :  { %v887_v54 = vpop.f32.mrf.mxu0  ;;  %v928_v55 = vpop.f32.mrf.mxu1 }
 0x24c   :  { %v893_v2 = vadd.f32 %v887_v54, %v3778_v1  ;;  %v934_v61 = vadd.f32 %v928_v55, %v3784_v5  ;;  %v948_v1 = vmul.f32 %v942_v63, %v3866_v12  ;;  %v3985_v12 = vld [vmem:[#allocation10 + $0xe0] ss:$16 sps:$4 sm:$0xff]   ;;  %v3988_v54 = vld [vmem:[#allocation10 + $0xe4] ss:$16 sps:$4 sm:$0xff]  }
 0x24d   :  { %v2680_v7 = vpop.f32.mrf.mxu0  ;;  %v2700_v15 = vpop.f32.mrf.mxu1 }
 0x24e   :  { %3278 = vtanh.f32 %v893_v2  ;;  %v944_v10 = vmul.f32 0.5, %v934_v61 }
 0x24f   :  { %v890_v58 = vpop.f32.mrf.mxu0  ;;  %v931_v60 = vpop.f32.mrf.mxu1 }
 0x250   :  { %3280 = vtanh.f32 %v944_v10 }
 0x251   :  { %v2681_v49 = vpop.f32.mrf.mxu0  ;;  %v2701_v4 = vpop.f32.mrf.mxu1 }
 0x25b   :  { %v3279_v59 = vpop.eup %3278 }
 0x25c   :  { %v949_v6 = vmul.f32 %v3279_v59, %v938_v53 }
 0x25d   :  { %v3281_v3 = vpop.eup %3280 }
 0x25e   :  { %v3946_v51 = vadd.f32 %v949_v6, %v948_v1  ;;  %v946_v5 = vmul.f32 0.5, %v3281_v3 }
 0x260   :  { %3282 = vtanh.f32 %v3946_v51  ;;  %v947_v20 = vadd.f32 0.5, %v946_v5 }
 0x26d   :  { %v3283_v56 = vpop.eup %3282 }
 0x26e   :  { %v952_v48 = vmul.f32 %v3283_v56, %v947_v20 }
 0x270   :  { %v953_v62 = vpack.c.bf16 %v952_v48, %v952_v48 }
 0x272   :  { %2719 = vmatmul.mubr.bf16.vlgmr.msra.gmra.mxu0 %v953_v62  ;;  %2739 = vmatmul.mubr.bf16.vlgmr.msra.gmra.mxu1 %v953_v62 }
 0x273   :  { %2743 = vmatpush3.bf16.msra.mxu0 %v3650_v30  ;;  %2763 = vmatpush3.bf16.msra.mxu1 %v3654_v31 }
 0x274   :  { %2744 = vmatprep.subr.bf16.mxu0 %v4496_v57  ;;  %2764 = vmatprep.subr.bf16.mxu1 %v4496_v57 }
 0x275   :  { %2758 = vmatprep.mubr.msk.bf16.mxu0 %vm3515_vm2, %v4496_v57  ;;  %2778 = vmatprep.mubr.msk.bf16.mxu1 %vm3515_vm2, %v4496_v57 }
 0x277   :  { %2745 = vmatpush3.bf16.msra.mxu0 %v3658_v32  ;;  %2765 = vmatpush3.bf16.msra.mxu1 %v3660_v33 }
 0x278   :  { %2746 = vmatprep.subr.bf16.mxu0 %v4496_v57  ;;  %2766 = vmatprep.subr.bf16.mxu1 %v4496_v57 }
 0x27b   :  { %2747 = vmatpush3.bf16.msra.mxu0 %v3672_v35  ;;  %2767 = vmatpush3.bf16.msra.mxu1 %v3674_v36 }
 0x27c   :  { %2748 = vmatprep.subr.bf16.mxu0 %v4496_v57  ;;  %2768 = vmatprep.subr.bf16.mxu1 %v4496_v57 }
 0x27f   :  { %2749 = vmatpush3.bf16.msra.mxu0 %v3680_v37  ;;  %2769 = vmatpush3.bf16.msra.mxu1 %v3682_v38 }
 0x280   :  { %2750 = vmatprep.subr.bf16.mxu0 %v4496_v57  ;;  %2770 = vmatprep.subr.bf16.mxu1 %v4496_v57 }
 0x283   :  { %2751 = vmatpush3.bf16.msra.mxu0 %v3688_v39  ;;  %2771 = vmatpush3.bf16.msra.mxu1 %v3690_v40 }
 0x284   :  { %2752 = vmatprep.subr.bf16.mxu0 %v4496_v57  ;;  %2772 = vmatprep.subr.bf16.mxu1 %v4496_v57 }
 0x287   :  { %2753 = vmatpush3.bf16.msra.mxu0 %v3696_v41  ;;  %2773 = vmatpush3.bf16.msra.mxu1 %v3698_v42 }
 0x288   :  { %2754 = vmatprep.subr.bf16.mxu0 %v4496_v57  ;;  %2774 = vmatprep.subr.bf16.mxu1 %v4496_v57 }
 0x28b   :  { %2755 = vmatpush3.bf16.msra.mxu0 %v3704_v43  ;;  %2775 = vmatpush3.bf16.msra.mxu1 %v3706_v44 }
 0x28c   :  { %2756 = vmatprep.subr.bf16.mxu0 %v4496_v57  ;;  %2776 = vmatprep.subr.bf16.mxu1 %v4496_v57 }
 0x28f   :  { %2757 = vmatpush3.bf16.msra.mxu0 %v3712_v45  ;;  %2777 = vmatpush3.bf16.msra.mxu1 %v3714_v46 }
 0x290   :  { %2782 = vmatprep.subr.bf16.mxu0 %v4496_v57  ;;  %2802 = vmatprep.subr.bf16.mxu1 %v4496_v57 }
 0x292   :  { %2759 = vmatmul.mubr.bf16.vlgmr.msra.gmra.mxu0 %v953_v62  ;;  %2779 = vmatmul.mubr.bf16.vlgmr.msra.gmra.mxu1 %v953_v62 }
 0x293   :  { %2783 = vmatpush3.bf16.msra.mxu0 %v3985_v12  ;;  %2803 = vmatpush3.bf16.msra.mxu1 %v3988_v54 }
 0x294   :  { %2784 = vmatprep.subr.bf16.mxu0 %v4496_v57  ;;  %2804 = vmatprep.subr.bf16.mxu1 %v4496_v57 }
 0x295   :  { %2798 = vmatprep.mubr.msk.bf16.mxu0 %vm3515_vm2, %v4496_v57  ;;  %2818 = vmatprep.mubr.msk.bf16.mxu1 %vm3515_vm2, %v4496_v57 }
 0x297   :  { %2785 = vmatpush3.bf16.msra.mxu0 %v3578_v13  ;;  %2805 = vmatpush3.bf16.msra.mxu1 %v3582_v14 }
 0x298   :  { %2786 = vmatprep.subr.bf16.mxu0 %v4496_v57  ;;  %2806 = vmatprep.subr.bf16.mxu1 %v4496_v57 }
 0x29b   :  { %2787 = vmatpush3.bf16.msra.mxu0 %v3588_v16  ;;  %2807 = vmatpush3.bf16.msra.mxu1 %v3592_v17 }
 0x29c   :  { %2788 = vmatprep.subr.bf16.mxu0 %v4496_v57  ;;  %2808 = vmatprep.subr.bf16.mxu1 %v4496_v57 }
 0x29f   :  { %2789 = vmatpush3.bf16.msra.mxu0 %v3598_v18  ;;  %2809 = vmatpush3.bf16.msra.mxu1 %v3602_v19 }
 0x2a0   :  { %2790 = vmatprep.subr.bf16.mxu0 %v4496_v57  ;;  %2810 = vmatprep.subr.bf16.mxu1 %v4496_v57 }
 0x2a3   :  { %2791 = vmatpush3.bf16.msra.mxu0 %v3608_v21  ;;  %2811 = vmatpush3.bf16.msra.mxu1 %v3612_v22 }
 0x2a4   :  { %2792 = vmatprep.subr.bf16.mxu0 %v4496_v57  ;;  %2812 = vmatprep.subr.bf16.mxu1 %v4496_v57 }
 0x2a7   :  { %2793 = vmatpush3.bf16.msra.mxu0 %v3618_v23  ;;  %2813 = vmatpush3.bf16.msra.mxu1 %v3622_v24 }
 0x2a8   :  { %2794 = vmatprep.subr.bf16.mxu0 %v4496_v57  ;;  %2814 = vmatprep.subr.bf16.mxu1 %v4496_v57 }
 0x2ab   :  { %2795 = vmatpush3.bf16.msra.mxu0 %v3628_v26  ;;  %2815 = vmatpush3.bf16.msra.mxu1 %v3632_v27 }
 0x2ac   :  { %2796 = vmatprep.subr.bf16.mxu0 %v4496_v57  ;;  %2816 = vmatprep.subr.bf16.mxu1 %v4496_v57 }
 0x2af   :  { %2797 = vmatpush3.bf16.msra.mxu0 %v3638_v28  ;;  %2817 = vmatpush3.bf16.msra.mxu1 %v3642_v29 }
 0x2b0   :  { %2822 = vmatprep.subr.bf16.mxu0 %v4496_v57  ;;  %2842 = vmatprep.subr.bf16.mxu1 %v4496_v57 }
 0x332   :  { %v988_v13 = vpop.f32.mrf.mxu0  ;;  %v1029_v14 = vpop.f32.mrf.mxu1 }
 0x333   :  { %v1035_v23 = vadd.f32 %v1029_v14, %v3793_v25  ;;  %v994_v24 = vadd.f32 %v988_v13, %v3787_v8  ;;  %v4497_v14 = vld [vmem:[#allocation20_spill] sm:$0xff] }
 0x334   :  { %v2720_v16 = vpop.f32.mrf.mxu0  ;;  %v2740_v17 = vpop.f32.mrf.mxu1 }
 0x335   :  { %v1122_v26 = vmul.f32 0.5, %v1035_v23  ;;  %v1118_v27 = vmul.f32 0.5, %v994_v24  ;;  %v4498_v17 = vld [vmem:[#allocation18_spill] sm:$0xff]  ;;  %v4499_v24 = vld [vmem:[#allocation19_spill] sm:$0xff] }
 0x336   :  { %v991_v18 = vpop.f32.mrf.mxu0  ;;  %v1032_v19 = vpop.f32.mrf.mxu1 }
 0x337   :  { %3284 = vtanh.f32 %v1122_v26 }
 0x338   :  { %v2721_v21 = vpop.f32.mrf.mxu0  ;;  %v2741_v22 = vpop.f32.mrf.mxu1  ;;  %3286 = vtanh.f32 %v1118_v27 }
 0x344   :  { %v3285_v61 = vpop.eup %3284 }
 0x345   :  { %v3287_v49 = vpop.eup %3286  ;;  %v1124_v8 = vmul.f32 0.5, %v3285_v61 }
 0x346   :  { %v1120_v52 = vmul.f32 0.5, %v3287_v49 }
 0x347   :  { %v1125_v0 = vadd.f32 0.5, %v1124_v8 }
 0x348   :  { %v1121_v10 = vadd.f32 0.5, %v1120_v52 }
 0x352   :  { %v1070_v28 = vpop.f32.mrf.mxu0  ;;  %v1111_v29 = vpop.f32.mrf.mxu1 }
 0x353   :  { %v1076_v55 = vadd.f32 %v1070_v28, %v3790_v9  ;;  %v1117_v60 = vadd.f32 %v1111_v29, %v3796_v34  ;;  %v1131_v9 = vmul.f32 %v1125_v0, %v3946_v51 }
 0x354   :  { %v2760_v2 = vpop.f32.mrf.mxu0  ;;  %v2780_v7 = vpop.f32.mrf.mxu1 }
 0x355   :  { %3288 = vtanh.f32 %v1076_v55  ;;  %v1127_v4 = vmul.f32 0.5, %v1117_v60  ;;  %v4500_v2 = vld [vmem:[#allocation21_spill] sm:$0xff] }
 0x356   :  { %v1073_v15 = vpop.f32.mrf.mxu0  ;;  %v1114_v58 = vpop.f32.mrf.mxu1 }
 0x357   :  { %3290 = vtanh.f32 %v1127_v4 }
 0x358   :  { %v2761_v50 = vpop.f32.mrf.mxu0  ;;  %v2781_v25 = vpop.f32.mrf.mxu1 }
 0x362   :  { %v3289_v11 = vpop.eup %3288 }
 0x363   :  { %v1132_v63 = vmul.f32 %v3289_v11, %v1121_v10 }
 0x364   :  { %v3291_v59 = vpop.eup %3290 }
 0x365   :  { %v4030_v53 = vadd.f32 %v1132_v63, %v1131_v9  ;;  %v1129_v34 = vmul.f32 0.5, %v3291_v59 }
 0x367   :  { %3292 = vtanh.f32 %v4030_v53  ;;  %v1130_v1 = vadd.f32 0.5, %v1129_v34 }
 0x374   :  { %v3293_v6 = vpop.eup %3292 }
 0x375   :  { %v1135_v3 = vmul.f32 %v3293_v6, %v1130_v1 }
 0x377   :  { %v1136_v5 = vpack.c.bf16 %v1135_v3, %v1135_v3  ;;  %v4141_v3 = vld [vmem:[#allocation10 + $0xe8] ss:$16 sps:$4 sm:$0xff]  }
 0x379   :  { %2799 = vmatmul.mubr.bf16.vlgmr.msra.gmra.mxu0 %v1136_v5  ;;  %2819 = vmatmul.mubr.bf16.vlgmr.msra.gmra.mxu1 %v1136_v5 }
 0x37a   :  { %2823 = vmatpush3.bf16.msra.mxu0 %v3650_v30  ;;  %2843 = vmatpush3.bf16.msra.mxu1 %v3654_v31  ;;  %v4077_v30 = vld [vmem:[#allocation10 + $0xc0] ss:$16 sps:$4 sm:$0xff]   ;;  %v4080_v31 = vld [vmem:[#allocation10 + $0xc4] ss:$16 sps:$4 sm:$0xff]  }
 0x37b   :  { %2824 = vmatprep.subr.bf16.mxu0 %v4496_v57  ;;  %2844 = vmatprep.subr.bf16.mxu1 %v4496_v57 }
 0x37c   :  { %2838 = vmatprep.mubr.msk.bf16.mxu0 %vm3515_vm2, %v4496_v57  ;;  %2858 = vmatprep.mubr.msk.bf16.mxu1 %vm3515_vm2, %v4496_v57 }
 0x37e   :  { %2825 = vmatpush3.bf16.msra.mxu0 %v3658_v32  ;;  %2845 = vmatpush3.bf16.msra.mxu1 %v3660_v33  ;;  %v4085_v32 = vld [vmem:[#allocation10 + $0xa0] ss:$16 sps:$4 sm:$0xff]   ;;  %v4088_v33 = vld [vmem:[#allocation10 + $0xa4] ss:$16 sps:$4 sm:$0xff]  }
 0x37f   :  { %2826 = vmatprep.subr.bf16.mxu0 %v4496_v57  ;;  %2846 = vmatprep.subr.bf16.mxu1 %v4496_v57 }
 0x382   :  { %2827 = vmatpush3.bf16.msra.mxu0 %v3672_v35  ;;  %2847 = vmatpush3.bf16.msra.mxu1 %v3674_v36  ;;  %v4093_v35 = vld [vmem:[#allocation10 + $0x80] ss:$16 sps:$4 sm:$0xff]   ;;  %v4096_v36 = vld [vmem:[#allocation10 + $0x84] ss:$16 sps:$4 sm:$0xff]  }
 0x383   :  { %2828 = vmatprep.subr.bf16.mxu0 %v4496_v57  ;;  %2848 = vmatprep.subr.bf16.mxu1 %v4496_v57 }
 0x386   :  { %2829 = vmatpush3.bf16.msra.mxu0 %v3680_v37  ;;  %2849 = vmatpush3.bf16.msra.mxu1 %v3682_v38  ;;  %v4101_v37 = vld [vmem:[#allocation10 + $0x60] ss:$16 sps:$4 sm:$0xff]   ;;  %v4104_v38 = vld [vmem:[#allocation10 + $0x64] ss:$16 sps:$4 sm:$0xff]  }
 0x387   :  { %2830 = vmatprep.subr.bf16.mxu0 %v4496_v57  ;;  %2850 = vmatprep.subr.bf16.mxu1 %v4496_v57 }
 0x38a   :  { %2831 = vmatpush3.bf16.msra.mxu0 %v3688_v39  ;;  %2851 = vmatpush3.bf16.msra.mxu1 %v3690_v40  ;;  %v4109_v39 = vld [vmem:[#allocation10 + $0x40] ss:$16 sps:$4 sm:$0xff]   ;;  %v4112_v40 = vld [vmem:[#allocation10 + $0x44] ss:$16 sps:$4 sm:$0xff]  }
 0x38b   :  { %2832 = vmatprep.subr.bf16.mxu0 %v4496_v57  ;;  %2852 = vmatprep.subr.bf16.mxu1 %v4496_v57 }
 0x38e   :  { %2833 = vmatpush3.bf16.msra.mxu0 %v3696_v41  ;;  %2853 = vmatpush3.bf16.msra.mxu1 %v3698_v42  ;;  %v4117_v41 = vld [vmem:[#allocation10 + $0x20] ss:$16 sps:$4 sm:$0xff]   ;;  %v4120_v42 = vld [vmem:[#allocation10 + $0x24] ss:$16 sps:$4 sm:$0xff]  }
 0x38f   :  { %2834 = vmatprep.subr.bf16.mxu0 %v4496_v57  ;;  %2854 = vmatprep.subr.bf16.mxu1 %v4496_v57 }
 0x392   :  { %2835 = vmatpush3.bf16.msra.mxu0 %v3704_v43  ;;  %2855 = vmatpush3.bf16.msra.mxu1 %v3706_v44  ;;  %v4125_v43 = vld [vmem:[#allocation10] ss:$16 sps:$4 sm:$0xff]   ;;  %v4128_v44 = vld [vmem:[#allocation10 + $0x4] ss:$16 sps:$4 sm:$0xff]  }
 0x393   :  { %2836 = vmatprep.subr.bf16.mxu0 %v4496_v57  ;;  %2856 = vmatprep.subr.bf16.mxu1 %v4496_v57 }
 0x396   :  { %2837 = vmatpush3.bf16.msra.mxu0 %v3712_v45  ;;  %2857 = vmatpush3.bf16.msra.mxu1 %v3714_v46 }
 0x397   :  { %2862 = vmatprep.subr.bf16.mxu0 %v4496_v57  ;;  %2882 = vmatprep.subr.bf16.mxu1 %v4496_v57 }
 0x399   :  { %2839 = vmatmul.mubr.bf16.vlgmr.msra.gmra.mxu0 %v1136_v5  ;;  %2859 = vmatmul.mubr.bf16.vlgmr.msra.gmra.mxu1 %v1136_v5  ;;  %v4144_v5 = vld [vmem:[#allocation10 + $0xec] ss:$16 sps:$4 sm:$0xff]  }
 0x39a   :  { %2863 = vmatpush3.bf16.msra.mxu0 %v3985_v12  ;;  %2883 = vmatpush3.bf16.msra.mxu1 %v3988_v54 }
 0x39b   :  { %2864 = vmatprep.subr.bf16.mxu0 %v4496_v57  ;;  %2884 = vmatprep.subr.bf16.mxu1 %v4496_v57 }
 0x39c   :  { %2878 = vmatprep.mubr.msk.bf16.mxu0 %vm3515_vm2, %v4496_v57  ;;  %2898 = vmatprep.mubr.msk.bf16.mxu1 %vm3515_vm2, %v4496_v57 }
 0x39e   :  { %2865 = vmatpush3.bf16.msra.mxu0 %v4077_v30  ;;  %2885 = vmatpush3.bf16.msra.mxu1 %v4080_v31 }
 0x39f   :  { %2866 = vmatprep.subr.bf16.mxu0 %v4496_v57  ;;  %2886 = vmatprep.subr.bf16.mxu1 %v4496_v57 }
 0x3a2   :  { %2867 = vmatpush3.bf16.msra.mxu0 %v4085_v32  ;;  %2887 = vmatpush3.bf16.msra.mxu1 %v4088_v33 }
 0x3a3   :  { %2868 = vmatprep.subr.bf16.mxu0 %v4496_v57  ;;  %2888 = vmatprep.subr.bf16.mxu1 %v4496_v57 }
 0x3a6   :  { %2869 = vmatpush3.bf16.msra.mxu0 %v4093_v35  ;;  %2889 = vmatpush3.bf16.msra.mxu1 %v4096_v36 }
 0x3a7   :  { %2870 = vmatprep.subr.bf16.mxu0 %v4496_v57  ;;  %2890 = vmatprep.subr.bf16.mxu1 %v4496_v57 }
 0x3aa   :  { %2871 = vmatpush3.bf16.msra.mxu0 %v4101_v37  ;;  %2891 = vmatpush3.bf16.msra.mxu1 %v4104_v38 }
 0x3ab   :  { %2872 = vmatprep.subr.bf16.mxu0 %v4496_v57  ;;  %2892 = vmatprep.subr.bf16.mxu1 %v4496_v57 }
 0x3ae   :  { %2873 = vmatpush3.bf16.msra.mxu0 %v4109_v39  ;;  %2893 = vmatpush3.bf16.msra.mxu1 %v4112_v40 }
 0x3af   :  { %2874 = vmatprep.subr.bf16.mxu0 %v4496_v57  ;;  %2894 = vmatprep.subr.bf16.mxu1 %v4496_v57 }
 0x3b2   :  { %2875 = vmatpush3.bf16.msra.mxu0 %v4117_v41  ;;  %2895 = vmatpush3.bf16.msra.mxu1 %v4120_v42 }
 0x3b3   :  { %2876 = vmatprep.subr.bf16.mxu0 %v4496_v57  ;;  %2896 = vmatprep.subr.bf16.mxu1 %v4496_v57 }
 0x3b6   :  { %2877 = vmatpush3.bf16.msra.mxu0 %v4125_v43  ;;  %2897 = vmatpush3.bf16.msra.mxu1 %v4128_v44 }
 0x3b7   :  { %2902 = vmatprep.subr.bf16.mxu0 %v4496_v57  ;;  %2922 = vmatprep.subr.bf16.mxu1 %v4496_v57 }
 0x439   :  { %v1171_v45 = vpop.f32.mrf.mxu0  ;;  %v1212_v46 = vpop.f32.mrf.mxu1 }
 0x43a   :  { %v1218_v16 = vadd.f32 %v1212_v46, %v4497_v14  ;;  %v1177_v18 = vadd.f32 %v1171_v45, %v4498_v17  ;;  %v4156_v45 = vld [vmem:[#allocation10 + $0xcc] ss:$16 sps:$4 sm:$0xff]   ;;  %v4161_v46 = vld [vmem:[#allocation10 + $0xa8] ss:$16 sps:$4 sm:$0xff]  }
 0x43b   :  { %v2800_v51 = vpop.f32.mrf.mxu0  ;;  %v2820_v20 = vpop.f32.mrf.mxu1  ;;  %v4188_v14 = vld [vmem:[#allocation10 + $0x4c] ss:$16 sps:$4 sm:$0xff]  }
 0x43c   :  { %v1305_v19 = vmul.f32 0.5, %v1218_v16  ;;  %v1301_v21 = vmul.f32 0.5, %v1177_v18  ;;  %v4164_v51 = vld [vmem:[#allocation10 + $0xac] ss:$16 sps:$4 sm:$0xff]   ;;  %v4169_v20 = vld [vmem:[#allocation10 + $0x88] ss:$16 sps:$4 sm:$0xff]  }
 0x43d   :  { %v1174_v56 = vpop.f32.mrf.mxu0  ;;  %v1215_v48 = vpop.f32.mrf.mxu1  ;;  %v4193_v16 = vld [vmem:[#allocation10 + $0x28] ss:$16 sps:$4 sm:$0xff]   ;;  %v4196_v17 = vld [vmem:[#allocation10 + $0x2c] ss:$16 sps:$4 sm:$0xff]  }
 0x43e   :  { %3294 = vtanh.f32 %v1305_v19  ;;  %v4172_v56 = vld [vmem:[#allocation10 + $0x8c] ss:$16 sps:$4 sm:$0xff]   ;;  %v4177_v48 = vld [vmem:[#allocation10 + $0x68] ss:$16 sps:$4 sm:$0xff]  }
 0x43f   :  { %v2801_v62 = vpop.f32.mrf.mxu0  ;;  %v2821_v13 = vpop.f32.mrf.mxu1  ;;  %3296 = vtanh.f32 %v1301_v21  ;;  %v4201_v18 = vld [vmem:[#allocation10 + $0x8] ss:$16 sps:$4 sm:$0xff]   ;;  %v4204_v19 = vld [vmem:[#allocation10 + $0xc] ss:$16 sps:$4 sm:$0xff]  }
 0x440   :  { %v4180_v62 = vld [vmem:[#allocation10 + $0x6c] ss:$16 sps:$4 sm:$0xff]   ;;  %v4185_v13 = vld [vmem:[#allocation10 + $0x48] ss:$16 sps:$4 sm:$0xff]  }
 0x44b   :  { %v3295_v15 = vpop.eup %3294 }
 0x44c   :  { %v3297_v61 = vpop.eup %3296  ;;  %v1307_v50 = vmul.f32 0.5, %v3295_v15 }
 0x44d   :  { %v1303_v49 = vmul.f32 0.5, %v3297_v61 }
 0x44e   :  { %v1308_v8 = vadd.f32 0.5, %v1307_v50 }
 0x44f   :  { %v1304_v4 = vadd.f32 0.5, %v1303_v49 }
 0x450   :  { %v1314_v0 = vmul.f32 %v1308_v8, %v4030_v53  ;;  %v4153_v53 = vld [vmem:[#allocation10 + $0xc8] ss:$16 sps:$4 sm:$0xff]  }
 0x459   :  { %v1253_v22 = vpop.f32.mrf.mxu0  ;;  %v1294_v23 = vpop.f32.mrf.mxu1 }
 0x45a   :  { %v1259_v26 = vadd.f32 %v1253_v22, %v4499_v24  ;;  %v1300_v7 = vadd.f32 %v1294_v23, %v4500_v2 }
 0x45b   :  { %v2840_v27 = vpop.f32.mrf.mxu0  ;;  %v2860_v28 = vpop.f32.mrf.mxu1 }
 0x45c   :  { %3298 = vtanh.f32 %v1259_v26  ;;  %v1310_v25 = vmul.f32 0.5, %v1300_v7  ;;  %v4502_v7 = vld [vmem:[#allocation22_spill] sm:$0xff] }
 0x45d   :  { %v1256_v29 = vpop.f32.mrf.mxu0  ;;  %v1297_v55 = vpop.f32.mrf.mxu1 }
 0x45e   :  { %3300 = vtanh.f32 %v1310_v25  ;;  %v4501_v55 = vld [vmem:[#allocation24_spill] sm:$0xff]  ;;  %v4503_v25 = vld [vmem:[#allocation23_spill] sm:$0xff] }
 0x45f   :  { %v2841_v58 = vpop.f32.mrf.mxu0  ;;  %v2861_v60 = vpop.f32.mrf.mxu1 }
 0x469   :  { %v3299_v52 = vpop.eup %3298 }
 0x46a   :  { %v1315_v10 = vmul.f32 %v3299_v52, %v1304_v4 }
 0x46b   :  { %v3301_v9 = vpop.eup %3300 }
 0x46c   :  { %v4138_v11 = vadd.f32 %v1315_v10, %v1314_v0  ;;  %v1312_v63 = vmul.f32 0.5, %v3301_v9  ;;  %v4504_v10 = vld [vmem:[#allocation25_spill] sm:$0xff] }
 0x46e   :  { %3302 = vtanh.f32 %v4138_v11  ;;  %v1313_v59 = vadd.f32 0.5, %v1312_v63 }
 0x47b   :  { %v3303_v34 = vpop.eup %3302 }
 0x47c   :  { %v1318_v1 = vmul.f32 %v3303_v34, %v1313_v59 }
 0x47e   :  { %v1319_v6 = vpack.c.bf16 %v1318_v1, %v1318_v1 }
 0x480   :  { %2879 = vmatmul.mubr.bf16.vlgmr.msra.gmra.mxu0 %v1319_v6  ;;  %2899 = vmatmul.mubr.bf16.vlgmr.msra.gmra.mxu1 %v1319_v6 }
 0x481   :  { %2903 = vmatpush3.bf16.msra.mxu0 %v4141_v3  ;;  %2923 = vmatpush3.bf16.msra.mxu1 %v4144_v5 }
 0x482   :  { %2904 = vmatprep.subr.bf16.mxu0 %v4496_v57  ;;  %2924 = vmatprep.subr.bf16.mxu1 %v4496_v57 }
 0x483   :  { %2918 = vmatprep.mubr.msk.bf16.mxu0 %vm3515_vm2, %v4496_v57  ;;  %2938 = vmatprep.mubr.msk.bf16.mxu1 %vm3515_vm2, %v4496_v57 }
 0x485   :  { %2905 = vmatpush3.bf16.msra.mxu0 %v4153_v53  ;;  %2925 = vmatpush3.bf16.msra.mxu1 %v4156_v45 }
 0x486   :  { %2906 = vmatprep.subr.bf16.mxu0 %v4496_v57  ;;  %2926 = vmatprep.subr.bf16.mxu1 %v4496_v57 }
 0x489   :  { %2907 = vmatpush3.bf16.msra.mxu0 %v4161_v46  ;;  %2927 = vmatpush3.bf16.msra.mxu1 %v4164_v51 }
 0x48a   :  { %2908 = vmatprep.subr.bf16.mxu0 %v4496_v57  ;;  %2928 = vmatprep.subr.bf16.mxu1 %v4496_v57 }
 0x48d   :  { %2909 = vmatpush3.bf16.msra.mxu0 %v4169_v20  ;;  %2929 = vmatpush3.bf16.msra.mxu1 %v4172_v56 }
 0x48e   :  { %2910 = vmatprep.subr.bf16.mxu0 %v4496_v57  ;;  %2930 = vmatprep.subr.bf16.mxu1 %v4496_v57 }
 0x491   :  { %2911 = vmatpush3.bf16.msra.mxu0 %v4177_v48  ;;  %2931 = vmatpush3.bf16.msra.mxu1 %v4180_v62 }
 0x492   :  { %2912 = vmatprep.subr.bf16.mxu0 %v4496_v57  ;;  %2932 = vmatprep.subr.bf16.mxu1 %v4496_v57 }
 0x495   :  { %2913 = vmatpush3.bf16.msra.mxu0 %v4185_v13  ;;  %2933 = vmatpush3.bf16.msra.mxu1 %v4188_v14 }
 0x496   :  { %2914 = vmatprep.subr.bf16.mxu0 %v4496_v57  ;;  %2934 = vmatprep.subr.bf16.mxu1 %v4496_v57 }
 0x499   :  { %2915 = vmatpush3.bf16.msra.mxu0 %v4193_v16  ;;  %2935 = vmatpush3.bf16.msra.mxu1 %v4196_v17 }
 0x49a   :  { %2916 = vmatprep.subr.bf16.mxu0 %v4496_v57  ;;  %2936 = vmatprep.subr.bf16.mxu1 %v4496_v57 }
 0x49d   :  { %2917 = vmatpush3.bf16.msra.mxu0 %v4201_v18  ;;  %2937 = vmatpush3.bf16.msra.mxu1 %v4204_v19 }
 0x49e   :  { %2942 = vmatprep.subr.bf16.mxu0 %v4496_v57  ;;  %2962 = vmatprep.subr.bf16.mxu1 %v4496_v57 }
 0x4a0   :  { %2919 = vmatmul.mubr.bf16.vlgmr.msra.gmra.mxu0 %v1319_v6  ;;  %2939 = vmatmul.mubr.bf16.vlgmr.msra.gmra.mxu1 %v1319_v6 }
 0x4a1   :  { %2943 = vmatpush3.bf16.msra.mxu0 %v3985_v12  ;;  %2963 = vmatpush3.bf16.msra.mxu1 %v3988_v54 }
 0x4a2   :  { %2944 = vmatprep.subr.bf16.mxu0 %v4496_v57  ;;  %2964 = vmatprep.subr.bf16.mxu1 %v4496_v57 }
 0x4a3   :  { %2958 = vmatprep.mubr.msk.bf16.mxu0 %vm3515_vm2, %v4496_v57  ;;  %2978 = vmatprep.mubr.msk.bf16.mxu1 %vm3515_vm2, %v4496_v57 }
 0x4a5   :  { %2945 = vmatpush3.bf16.msra.mxu0 %v4077_v30  ;;  %2965 = vmatpush3.bf16.msra.mxu1 %v4080_v31 }
 0x4a6   :  { %2946 = vmatprep.subr.bf16.mxu0 %v4496_v57  ;;  %2966 = vmatprep.subr.bf16.mxu1 %v4496_v57 }
 0x4a9   :  { %2947 = vmatpush3.bf16.msra.mxu0 %v4085_v32  ;;  %2967 = vmatpush3.bf16.msra.mxu1 %v4088_v33 }
 0x4aa   :  { %2948 = vmatprep.subr.bf16.mxu0 %v4496_v57  ;;  %2968 = vmatprep.subr.bf16.mxu1 %v4496_v57 }
 0x4ad   :  { %2949 = vmatpush3.bf16.msra.mxu0 %v4093_v35  ;;  %2969 = vmatpush3.bf16.msra.mxu1 %v4096_v36 }
 0x4ae   :  { %2950 = vmatprep.subr.bf16.mxu0 %v4496_v57  ;;  %2970 = vmatprep.subr.bf16.mxu1 %v4496_v57 }
 0x4b1   :  { %2951 = vmatpush3.bf16.msra.mxu0 %v4101_v37  ;;  %2971 = vmatpush3.bf16.msra.mxu1 %v4104_v38 }
 0x4b2   :  { %2952 = vmatprep.subr.bf16.mxu0 %v4496_v57  ;;  %2972 = vmatprep.subr.bf16.mxu1 %v4496_v57 }
 0x4b5   :  { %2953 = vmatpush3.bf16.msra.mxu0 %v4109_v39  ;;  %2973 = vmatpush3.bf16.msra.mxu1 %v4112_v40 }
 0x4b6   :  { %2954 = vmatprep.subr.bf16.mxu0 %v4496_v57  ;;  %2974 = vmatprep.subr.bf16.mxu1 %v4496_v57 }
 0x4b9   :  { %2955 = vmatpush3.bf16.msra.mxu0 %v4117_v41  ;;  %2975 = vmatpush3.bf16.msra.mxu1 %v4120_v42 }
 0x4ba   :  { %2956 = vmatprep.subr.bf16.mxu0 %v4496_v57  ;;  %2976 = vmatprep.subr.bf16.mxu1 %v4496_v57 }
 0x4bd   :  { %2957 = vmatpush3.bf16.msra.mxu0 %v4125_v43  ;;  %2977 = vmatpush3.bf16.msra.mxu1 %v4128_v44 }
 0x4be   :  { %2982 = vmatprep.subr.bf16.mxu0 %v4496_v57  ;;  %3002 = vmatprep.subr.bf16.mxu1 %v4496_v57 }
 0x540   :  { %v1354_v21 = vpop.f32.mrf.mxu0  ;;  %v1395_v22 = vpop.f32.mrf.mxu1 }
 0x541   :  { %v1401_v2 = vadd.f32 %v1395_v22, %v4501_v55  ;;  %v1360_v15 = vadd.f32 %v1354_v21, %v4502_v7 }
 0x542   :  { %v2880_v23 = vpop.f32.mrf.mxu0  ;;  %v2900_v24 = vpop.f32.mrf.mxu1 }
 0x543   :  { %v1488_v58 = vmul.f32 0.5, %v1401_v2  ;;  %v1484_v60 = vmul.f32 0.5, %v1360_v15 }
 0x544   :  { %v1357_v26 = vpop.f32.mrf.mxu0  ;;  %v1398_v27 = vpop.f32.mrf.mxu1 }
 0x545   :  { %3304 = vtanh.f32 %v1488_v58 }
 0x546   :  { %v2881_v28 = vpop.f32.mrf.mxu0  ;;  %v2901_v29 = vpop.f32.mrf.mxu1  ;;  %3306 = vtanh.f32 %v1484_v60 }
 0x552   :  { %v3305_v63 = vpop.eup %3304 }
 0x553   :  { %v3307_v1 = vpop.eup %3306  ;;  %v1490_v6 = vmul.f32 0.5, %v3305_v63 }
 0x554   :  { %v1486_v22 = vmul.f32 0.5, %v3307_v1 }
 0x555   :  { %v1491_v23 = vadd.f32 0.5, %v1490_v6 }
 0x556   :  { %v1487_v24 = vadd.f32 0.5, %v1486_v22 }
 0x557   :  { %v1497_v27 = vmul.f32 %v1491_v23, %v4138_v11 }
 0x560   :  { %v1436_v61 = vpop.f32.mrf.mxu0  ;;  %v1477_v50 = vpop.f32.mrf.mxu1 }
 0x561   :  { %v1442_v49 = vadd.f32 %v1436_v61, %v4503_v25  ;;  %v1483_v9 = vadd.f32 %v1477_v50, %v4504_v10 }
 0x562   :  { %v2920_v8 = vpop.f32.mrf.mxu0  ;;  %v2940_v4 = vpop.f32.mrf.mxu1 }
 0x563   :  { %3308 = vtanh.f32 %v1442_v49  ;;  %v1493_v21 = vmul.f32 0.5, %v1483_v9  ;;  %v4506_v9 = vld [vmem:[#allocation26_spill] sm:$0xff] }
 0x564   :  { %v1439_v52 = vpop.f32.mrf.mxu0  ;;  %v1480_v0 = vpop.f32.mrf.mxu1 }
 0x565   :  { %3310 = vtanh.f32 %v1493_v21  ;;  %v4505_v0 = vld [vmem:[#allocation28_spill] sm:$0xff]  ;;  %v4507_v21 = vld [vmem:[#allocation27_spill] sm:$0xff] }
 0x566   :  { %v2921_v59 = vpop.f32.mrf.mxu0  ;;  %v2941_v34 = vpop.f32.mrf.mxu1 }
 0x570   :  { %v3309_v26 = vpop.eup %3308 }
 0x571   :  { %v1498_v28 = vmul.f32 %v3309_v26, %v1487_v24 }
 0x572   :  { %v3311_v55 = vpop.eup %3310 }
 0x573   :  { %v4250_v29 = vadd.f32 %v1498_v28, %v1497_v27  ;;  %v1495_v2 = vmul.f32 0.5, %v3311_v55  ;;  %v4508_v28 = vld [vmem:[#allocation29_spill] sm:$0xff] }
 0x575   :  { %3312 = vtanh.f32 %v4250_v29  ;;  %v1496_v7 = vadd.f32 0.5, %v1495_v2 }
 0x582   :  { %v3313_v15 = vpop.eup %3312 }
 0x583   :  { %v1501_v58 = vmul.f32 %v3313_v15, %v1496_v7 }
 0x585   :  { %v1502_v60 = vpack.c.bf16 %v1501_v58, %v1501_v58 }
 0x587   :  { %2959 = vmatmul.mubr.bf16.vlgmr.msra.gmra.mxu0 %v1502_v60  ;;  %2979 = vmatmul.mubr.bf16.vlgmr.msra.gmra.mxu1 %v1502_v60 }
 0x588   :  { %2983 = vmatpush3.bf16.msra.mxu0 %v4141_v3  ;;  %3003 = vmatpush3.bf16.msra.mxu1 %v4144_v5 }
 0x589   :  { %2984 = vmatprep.subr.bf16.mxu0 %v4496_v57  ;;  %3004 = vmatprep.subr.bf16.mxu1 %v4496_v57 }
 0x58a   :  { %2998 = vmatprep.mubr.msk.bf16.mxu0 %vm3515_vm2, %v4496_v57  ;;  %3018 = vmatprep.mubr.msk.bf16.mxu1 %vm3515_vm2, %v4496_v57 }
 0x58c   :  { %2985 = vmatpush3.bf16.msra.mxu0 %v4153_v53  ;;  %3005 = vmatpush3.bf16.msra.mxu1 %v4156_v45 }
 0x58d   :  { %2986 = vmatprep.subr.bf16.mxu0 %v4496_v57  ;;  %3006 = vmatprep.subr.bf16.mxu1 %v4496_v57 }
 0x590   :  { %2987 = vmatpush3.bf16.msra.mxu0 %v4161_v46  ;;  %3007 = vmatpush3.bf16.msra.mxu1 %v4164_v51 }
 0x591   :  { %2988 = vmatprep.subr.bf16.mxu0 %v4496_v57  ;;  %3008 = vmatprep.subr.bf16.mxu1 %v4496_v57 }
 0x594   :  { %2989 = vmatpush3.bf16.msra.mxu0 %v4169_v20  ;;  %3009 = vmatpush3.bf16.msra.mxu1 %v4172_v56 }
 0x595   :  { %2990 = vmatprep.subr.bf16.mxu0 %v4496_v57  ;;  %3010 = vmatprep.subr.bf16.mxu1 %v4496_v57 }
 0x598   :  { %2991 = vmatpush3.bf16.msra.mxu0 %v4177_v48  ;;  %3011 = vmatpush3.bf16.msra.mxu1 %v4180_v62 }
 0x599   :  { %2992 = vmatprep.subr.bf16.mxu0 %v4496_v57  ;;  %3012 = vmatprep.subr.bf16.mxu1 %v4496_v57 }
 0x59c   :  { %2993 = vmatpush3.bf16.msra.mxu0 %v4185_v13  ;;  %3013 = vmatpush3.bf16.msra.mxu1 %v4188_v14 }
 0x59d   :  { %2994 = vmatprep.subr.bf16.mxu0 %v4496_v57  ;;  %3014 = vmatprep.subr.bf16.mxu1 %v4496_v57 }
 0x5a0   :  { %2995 = vmatpush3.bf16.msra.mxu0 %v4193_v16  ;;  %3015 = vmatpush3.bf16.msra.mxu1 %v4196_v17 }
 0x5a1   :  { %2996 = vmatprep.subr.bf16.mxu0 %v4496_v57  ;;  %3016 = vmatprep.subr.bf16.mxu1 %v4496_v57 }
 0x5a4   :  { %2997 = vmatpush3.bf16.msra.mxu0 %v4201_v18  ;;  %3017 = vmatpush3.bf16.msra.mxu1 %v4204_v19 }
 0x5a5   :  { %3022 = vmatprep.subr.bf16.mxu0 %v4496_v57  ;;  %3042 = vmatprep.subr.bf16.mxu1 %v4496_v57 }
 0x5a7   :  { %2999 = vmatmul.mubr.bf16.vlgmr.msra.gmra.mxu0 %v1502_v60  ;;  %3019 = vmatmul.mubr.bf16.vlgmr.msra.gmra.mxu1 %v1502_v60 }
 0x5a8   :  { %3023 = vmatpush3.bf16.msra.mxu0 %v3985_v12  ;;  %3043 = vmatpush3.bf16.msra.mxu1 %v3988_v54 }
 0x5a9   :  { %3024 = vmatprep.subr.bf16.mxu0 %v4496_v57  ;;  %3044 = vmatprep.subr.bf16.mxu1 %v4496_v57 }
 0x5aa   :  { %3038 = vmatprep.mubr.msk.bf16.mxu0 %vm3515_vm2, %v4496_v57  ;;  %3058 = vmatprep.mubr.msk.bf16.mxu1 %vm3515_vm2, %v4496_v57 }
 0x5ac   :  { %3025 = vmatpush3.bf16.msra.mxu0 %v4077_v30  ;;  %3045 = vmatpush3.bf16.msra.mxu1 %v4080_v31 }
 0x5ad   :  { %3026 = vmatprep.subr.bf16.mxu0 %v4496_v57  ;;  %3046 = vmatprep.subr.bf16.mxu1 %v4496_v57 }
 0x5b0   :  { %3027 = vmatpush3.bf16.msra.mxu0 %v4085_v32  ;;  %3047 = vmatpush3.bf16.msra.mxu1 %v4088_v33 }
 0x5b1   :  { %3028 = vmatprep.subr.bf16.mxu0 %v4496_v57  ;;  %3048 = vmatprep.subr.bf16.mxu1 %v4496_v57 }
 0x5b4   :  { %3029 = vmatpush3.bf16.msra.mxu0 %v4093_v35  ;;  %3049 = vmatpush3.bf16.msra.mxu1 %v4096_v36 }
 0x5b5   :  { %3030 = vmatprep.subr.bf16.mxu0 %v4496_v57  ;;  %3050 = vmatprep.subr.bf16.mxu1 %v4496_v57 }
 0x5b8   :  { %3031 = vmatpush3.bf16.msra.mxu0 %v4101_v37  ;;  %3051 = vmatpush3.bf16.msra.mxu1 %v4104_v38 }
 0x5b9   :  { %3032 = vmatprep.subr.bf16.mxu0 %v4496_v57  ;;  %3052 = vmatprep.subr.bf16.mxu1 %v4496_v57 }
 0x5bc   :  { %3033 = vmatpush3.bf16.msra.mxu0 %v4109_v39  ;;  %3053 = vmatpush3.bf16.msra.mxu1 %v4112_v40 }
 0x5bd   :  { %3034 = vmatprep.subr.bf16.mxu0 %v4496_v57  ;;  %3054 = vmatprep.subr.bf16.mxu1 %v4496_v57 }
 0x5c0   :  { %3035 = vmatpush3.bf16.msra.mxu0 %v4117_v41  ;;  %3055 = vmatpush3.bf16.msra.mxu1 %v4120_v42 }
 0x5c1   :  { %3036 = vmatprep.subr.bf16.mxu0 %v4496_v57  ;;  %3056 = vmatprep.subr.bf16.mxu1 %v4496_v57 }
 0x5c4   :  { %3037 = vmatpush3.bf16.msra.mxu0 %v4125_v43  ;;  %3057 = vmatpush3.bf16.msra.mxu1 %v4128_v44 }
 0x5c5   :  { %3062 = vmatprep.subr.bf16.mxu0 %v4496_v57  ;;  %3082 = vmatprep.subr.bf16.mxu1 %v4496_v57 }
 0x647   :  { %v1537_v11 = vpop.f32.mrf.mxu0  ;;  %v1578_v61 = vpop.f32.mrf.mxu1 }
 0x648   :  { %v1584_v10 = vadd.f32 %v1578_v61, %v4505_v0  ;;  %v1543_v63 = vadd.f32 %v1537_v11, %v4506_v9 }
 0x649   :  { %v2960_v50 = vpop.f32.mrf.mxu0  ;;  %v2980_v25 = vpop.f32.mrf.mxu1 }
 0x64a   :  { %v1671_v59 = vmul.f32 0.5, %v1584_v10  ;;  %v1667_v34 = vmul.f32 0.5, %v1543_v63 }
 0x64b   :  { %v1540_v49 = vpop.f32.mrf.mxu0  ;;  %v1581_v8 = vpop.f32.mrf.mxu1 }
 0x64c   :  { %3314 = vtanh.f32 %v1671_v59 }
 0x64d   :  { %v2961_v4 = vpop.f32.mrf.mxu0  ;;  %v2981_v52 = vpop.f32.mrf.mxu1  ;;  %3316 = vtanh.f32 %v1667_v34 }
 0x659   :  { %v3315_v2 = vpop.eup %3314 }
 0x65a   :  { %v3317_v58 = vpop.eup %3316  ;;  %v1673_v60 = vmul.f32 0.5, %v3315_v2 }
 0x65b   :  { %v1669_v61 = vmul.f32 0.5, %v3317_v58 }
 0x65c   :  { %v1674_v50 = vadd.f32 0.5, %v1673_v60 }
 0x65d   :  { %v1670_v25 = vadd.f32 0.5, %v1669_v61 }
 0x65e   :  { %v1680_v8 = vmul.f32 %v1674_v50, %v4250_v29  ;;  %v4511_v29 = vld [vmem:[#allocation31_spill] sm:$0xff] }
 0x667   :  { %v1619_v1 = vpop.f32.mrf.mxu0  ;;  %v1660_v6 = vpop.f32.mrf.mxu1 }
 0x668   :  { %v1625_v22 = vadd.f32 %v1619_v1, %v4507_v21  ;;  %v1666_v55 = vadd.f32 %v1660_v6, %v4508_v28 }
 0x669   :  { %v3000_v23 = vpop.f32.mrf.mxu0  ;;  %v3020_v24 = vpop.f32.mrf.mxu1 }
 0x66a   :  { %3318 = vtanh.f32 %v1625_v22  ;;  %v1676_v11 = vmul.f32 0.5, %v1666_v55  ;;  %v4512_v24 = vld [vmem:[#allocation33_spill] sm:$0xff] }
 0x66b   :  { %v1622_v26 = vpop.f32.mrf.mxu0  ;;  %v1663_v27 = vpop.f32.mrf.mxu1 }
 0x66c   :  { %3320 = vtanh.f32 %v1676_v11 }
 0x66d   :  { %v3001_v7 = vpop.f32.mrf.mxu0  ;;  %v3021_v15 = vpop.f32.mrf.mxu1 }
 0x677   :  { %v3319_v49 = vpop.eup %3318 }
 0x678   :  { %v1681_v4 = vmul.f32 %v3319_v49, %v1670_v25 }
 0x679   :  { %v3321_v0 = vpop.eup %3320 }
 0x67a   :  { %v4330_v52 = vadd.f32 %v1681_v4, %v1680_v8  ;;  %v1678_v10 = vmul.f32 0.5, %v3321_v0 }
 0x67c   :  { %3322 = vtanh.f32 %v4330_v52  ;;  %v1679_v9 = vadd.f32 0.5, %v1678_v10 }
 0x689   :  { %v3323_v63 = vpop.eup %3322 }
 0x68a   :  { %v1684_v59 = vmul.f32 %v3323_v63, %v1679_v9 }
 0x68c   :  { %v1685_v34 = vpack.c.bf16 %v1684_v59, %v1684_v59 }
 0x68e   :  { %3039 = vmatmul.mubr.bf16.vlgmr.msra.gmra.mxu0 %v1685_v34  ;;  %3059 = vmatmul.mubr.bf16.vlgmr.msra.gmra.mxu1 %v1685_v34 }
 0x68f   :  { %3063 = vmatpush3.bf16.msra.mxu0 %v4141_v3  ;;  %3083 = vmatpush3.bf16.msra.mxu1 %v4144_v5 }
 0x690   :  { %3064 = vmatprep.subr.bf16.mxu0 %v4496_v57  ;;  %3084 = vmatprep.subr.bf16.mxu1 %v4496_v57 }
 0x691   :  { %3078 = vmatprep.mubr.msk.bf16.mxu0 %vm3515_vm2, %v4496_v57  ;;  %3098 = vmatprep.mubr.msk.bf16.mxu1 %vm3515_vm2, %v4496_v57 }
 0x693   :  { %3065 = vmatpush3.bf16.msra.mxu0 %v4153_v53  ;;  %3085 = vmatpush3.bf16.msra.mxu1 %v4156_v45 }
 0x694   :  { %3066 = vmatprep.subr.bf16.mxu0 %v4496_v57  ;;  %3086 = vmatprep.subr.bf16.mxu1 %v4496_v57 }
 0x697   :  { %3067 = vmatpush3.bf16.msra.mxu0 %v4161_v46  ;;  %3087 = vmatpush3.bf16.msra.mxu1 %v4164_v51 }
 0x698   :  { %3068 = vmatprep.subr.bf16.mxu0 %v4496_v57  ;;  %3088 = vmatprep.subr.bf16.mxu1 %v4496_v57 }
 0x69b   :  { %3069 = vmatpush3.bf16.msra.mxu0 %v4169_v20  ;;  %3089 = vmatpush3.bf16.msra.mxu1 %v4172_v56 }
 0x69c   :  { %3070 = vmatprep.subr.bf16.mxu0 %v4496_v57  ;;  %3090 = vmatprep.subr.bf16.mxu1 %v4496_v57 }
 0x69f   :  { %3071 = vmatpush3.bf16.msra.mxu0 %v4177_v48  ;;  %3091 = vmatpush3.bf16.msra.mxu1 %v4180_v62 }
 0x6a0   :  { %3072 = vmatprep.subr.bf16.mxu0 %v4496_v57  ;;  %3092 = vmatprep.subr.bf16.mxu1 %v4496_v57 }
 0x6a3   :  { %3073 = vmatpush3.bf16.msra.mxu0 %v4185_v13  ;;  %3093 = vmatpush3.bf16.msra.mxu1 %v4188_v14 }
 0x6a4   :  { %3074 = vmatprep.subr.bf16.mxu0 %v4496_v57  ;;  %3094 = vmatprep.subr.bf16.mxu1 %v4496_v57 }
 0x6a7   :  { %3075 = vmatpush3.bf16.msra.mxu0 %v4193_v16  ;;  %3095 = vmatpush3.bf16.msra.mxu1 %v4196_v17 }
 0x6a8   :  { %3076 = vmatprep.subr.bf16.mxu0 %v4496_v57  ;;  %3096 = vmatprep.subr.bf16.mxu1 %v4496_v57 }
 0x6ab   :  { %3077 = vmatpush3.bf16.msra.mxu0 %v4201_v18  ;;  %3097 = vmatpush3.bf16.msra.mxu1 %v4204_v19 }
 0x6ac   :  { %3102 = vmatprep.subr.bf16.mxu0 %v4496_v57  ;;  %3122 = vmatprep.subr.bf16.mxu1 %v4496_v57 }
 0x6ae   :  { %3079 = vmatmul.mubr.bf16.vlgmr.msra.gmra.mxu0 %v1685_v34  ;;  %3099 = vmatmul.mubr.bf16.vlgmr.msra.gmra.mxu1 %v1685_v34  ;;  %v4514_v34 = vld [vmem:[#allocation34_spill] sm:$0xff] }
 0x6af   :  { %3103 = vmatpush3.bf16.msra.mxu0 %v3985_v12  ;;  %3123 = vmatpush3.bf16.msra.mxu1 %v3988_v54 }
 0x6b0   :  { %3104 = vmatprep.subr.bf16.mxu0 %v4496_v57  ;;  %3124 = vmatprep.subr.bf16.mxu1 %v4496_v57 }
 0x6b1   :  { %3118 = vmatprep.mubr.msk.bf16.mxu0 %vm3515_vm2, %v4496_v57  ;;  %3138 = vmatprep.mubr.msk.bf16.mxu1 %vm3515_vm2, %v4496_v57 }
 0x6b3   :  { %3105 = vmatpush3.bf16.msra.mxu0 %v4077_v30  ;;  %3125 = vmatpush3.bf16.msra.mxu1 %v4080_v31 }
 0x6b4   :  { %3106 = vmatprep.subr.bf16.mxu0 %v4496_v57  ;;  %3126 = vmatprep.subr.bf16.mxu1 %v4496_v57 }
 0x6b7   :  { %3107 = vmatpush3.bf16.msra.mxu0 %v4085_v32  ;;  %3127 = vmatpush3.bf16.msra.mxu1 %v4088_v33 }
 0x6b8   :  { %3108 = vmatprep.subr.bf16.mxu0 %v4496_v57  ;;  %3128 = vmatprep.subr.bf16.mxu1 %v4496_v57 }
 0x6bb   :  { %3109 = vmatpush3.bf16.msra.mxu0 %v4093_v35  ;;  %3129 = vmatpush3.bf16.msra.mxu1 %v4096_v36 }
 0x6bc   :  { %3110 = vmatprep.subr.bf16.mxu0 %v4496_v57  ;;  %3130 = vmatprep.subr.bf16.mxu1 %v4496_v57 }
 0x6bf   :  { %3111 = vmatpush3.bf16.msra.mxu0 %v4101_v37  ;;  %3131 = vmatpush3.bf16.msra.mxu1 %v4104_v38  ;;  %v4509_v37 = vld [vmem:[#allocation32_spill] sm:$0xff] }
 0x6c0   :  { %3112 = vmatprep.subr.bf16.mxu0 %v4496_v57  ;;  %3132 = vmatprep.subr.bf16.mxu1 %v4496_v57 }
 0x6c3   :  { %3113 = vmatpush3.bf16.msra.mxu0 %v4109_v39  ;;  %3133 = vmatpush3.bf16.msra.mxu1 %v4112_v40  ;;  %v4510_v39 = vld [vmem:[#allocation30_spill] sm:$0xff] }
 0x6c4   :  { %3114 = vmatprep.subr.bf16.mxu0 %v4496_v57  ;;  %3134 = vmatprep.subr.bf16.mxu1 %v4496_v57 }
 0x6c7   :  { %3115 = vmatpush3.bf16.msra.mxu0 %v4117_v41  ;;  %3135 = vmatpush3.bf16.msra.mxu1 %v4120_v42 }
 0x6c8   :  { %3116 = vmatprep.subr.bf16.mxu0 %v4496_v57  ;;  %3136 = vmatprep.subr.bf16.mxu1 %v4496_v57 }
 0x6cb   :  { %3117 = vmatpush3.bf16.msra.mxu0 %v4125_v43  ;;  %3137 = vmatpush3.bf16.msra.mxu1 %v4128_v44 }
 0x6cc   :  { %3142 = vmatprep.subr.bf16.mxu0 %v4496_v57  ;;  %3162 = vmatprep.subr.bf16.mxu1 %v4496_v57 }
 0x74e   :  { %v1720_v12 = vpop.f32.mrf.mxu0  ;;  %v1761_v54 = vpop.f32.mrf.mxu1 }
 0x74f   :  { %v1767_v38 = vadd.f32 %v1761_v54, %v4509_v37  ;;  %v1726_v40 = vadd.f32 %v1720_v12, %v4510_v39 }
 0x750   :  { %v3040_v30 = vpop.f32.mrf.mxu0  ;;  %v3060_v31 = vpop.f32.mrf.mxu1 }
 0x751   :  { %v1854_v41 = vmul.f32 0.5, %v1767_v38  ;;  %v1850_v42 = vmul.f32 0.5, %v1726_v40 }
 0x752   :  { %v1723_v32 = vpop.f32.mrf.mxu0  ;;  %v1764_v33 = vpop.f32.mrf.mxu1 }
 0x753   :  { %3324 = vtanh.f32 %v1854_v41  ;;  %v4515_v32 = vld [vmem:[#allocation35_spill] sm:$0xff] }
 0x754   :  { %v3041_v35 = vpop.f32.mrf.mxu0  ;;  %v3061_v36 = vpop.f32.mrf.mxu1  ;;  %3326 = vtanh.f32 %v1850_v42 }
 0x760   :  { %v3325_v27 = vpop.eup %3324 }
 0x761   :  { %v3327_v2 = vpop.eup %3326  ;;  %v1856_v7 = vmul.f32 0.5, %v3325_v27 }
 0x762   :  { %v1852_v58 = vmul.f32 0.5, %v3327_v2 }
 0x763   :  { %v1857_v60 = vadd.f32 0.5, %v1856_v7 }
 0x764   :  { %v1853_v11 = vadd.f32 0.5, %v1852_v58 }
 0x765   :  { %v1863_v50 = vmul.f32 %v1857_v60, %v4330_v52  ;;  %v4513_v52 = vld [vmem:[#allocation36_spill] sm:$0xff] }
 0x76e   :  { %v1802_v43 = vpop.f32.mrf.mxu0  ;;  %v1843_v44 = vpop.f32.mrf.mxu1 }
 0x76f   :  { %v1808_v1 = vadd.f32 %v1802_v43, %v4511_v29  ;;  %v1849_v26 = vadd.f32 %v1843_v44, %v4512_v24 }
 0x770   :  { %v3080_v6 = vpop.f32.mrf.mxu0  ;;  %v3100_v21 = vpop.f32.mrf.mxu1 }
 0x771   :  { %3328 = vtanh.f32 %v1808_v1  ;;  %v1859_v15 = vmul.f32 0.5, %v1849_v26 }
 0x772   :  { %v1805_v22 = vpop.f32.mrf.mxu0  ;;  %v1846_v23 = vpop.f32.mrf.mxu1 }
 0x773   :  { %3330 = vtanh.f32 %v1859_v15  ;;  %v2236_v15 = vld [vmem:[%s4473_s5] ss:$0 sm:$0xff] }
 0x774   :  { %v3081_v28 = vpop.f32.mrf.mxu0  ;;  %v3101_v55 = vpop.f32.mrf.mxu1 }
 0x77e   :  { %v3329_v61 = vpop.eup %3328 }
 0x77f   :  { %v1864_v25 = vmul.f32 %v3329_v61, %v1853_v11 }
 0x780   :  { %v3331_v8 = vpop.eup %3330 }
 0x781   :  { %v4410_v49 = vadd.f32 %v1864_v25, %v1863_v50  ;;  %v1861_v4 = vmul.f32 0.5, %v3331_v8 }
 0x783   :  { %3332 = vtanh.f32 %v4410_v49  ;;  %v1862_v0 = vadd.f32 0.5, %v1861_v4 }
 0x790   :  { %v3333_v10 = vpop.eup %3332 }
 0x791   :  { %v1867_v9 = vmul.f32 %v3333_v10, %v1862_v0 }
 0x793   :  { %v1868_v63 = vpack.c.bf16 %v1867_v9, %v1867_v9 }
 0x795   :  { %3119 = vmatmul.mubr.bf16.vlgmr.msra.gmra.mxu0 %v1868_v63  ;;  %3139 = vmatmul.mubr.bf16.vlgmr.msra.gmra.mxu1 %v1868_v63 }
 0x796   :  { %3143 = vmatpush3.bf16.msra.mxu0 %v4141_v3  ;;  %3163 = vmatpush3.bf16.msra.mxu1 %v4144_v5  ;;  %v3256_v3 = vld [vmem:[#allocation12 + $0x38] sm:$0xff]   ;;  %v3257_v5 = vld [vmem:[#allocation12 + $0x30] sm:$0xff]  }
 0x797   :  { %3144 = vmatprep.subr.bf16.mxu0 %v4496_v57  ;;  %3164 = vmatprep.subr.bf16.mxu1 %v4496_v57 }
 0x798   :  { %3158 = vmatprep.mubr.msk.bf16.mxu0 %vm3515_vm2, %v4496_v57  ;;  %3178 = vmatprep.mubr.msk.bf16.mxu1 %vm3515_vm2, %v4496_v57 }
 0x79a   :  { %3145 = vmatpush3.bf16.msra.mxu0 %v4153_v53  ;;  %3165 = vmatpush3.bf16.msra.mxu1 %v4156_v45  ;;  %v3258_v53 = vld [vmem:[#allocation12 + $0x28] sm:$0xff]   ;;  %v3259_v45 = vld [vmem:[#allocation12 + $0x20] sm:$0xff]  }
 0x79b   :  { %3146 = vmatprep.subr.bf16.mxu0 %v4496_v57  ;;  %3166 = vmatprep.subr.bf16.mxu1 %v4496_v57 }
 0x79e   :  { %3147 = vmatpush3.bf16.msra.mxu0 %v4161_v46  ;;  %3167 = vmatpush3.bf16.msra.mxu1 %v4164_v51  ;;  %v3260_v46 = vld [vmem:[#allocation12 + $0x18] sm:$0xff]   ;;  %v3261_v51 = vld [vmem:[#allocation12 + $0x10] sm:$0xff]  }
 0x79f   :  { %3148 = vmatprep.subr.bf16.mxu0 %v4496_v57  ;;  %3168 = vmatprep.subr.bf16.mxu1 %v4496_v57 }
 0x7a2   :  { %3149 = vmatpush3.bf16.msra.mxu0 %v4169_v20  ;;  %3169 = vmatpush3.bf16.msra.mxu1 %v4172_v56  ;;  %v3262_v20 = vld [vmem:[#allocation12 + $0x8] sm:$0xff]   ;;  %v3263_v56 = vld [vmem:[#allocation12] sm:$0xff]  }
 0x7a3   :  { %3150 = vmatprep.subr.bf16.mxu0 %v4496_v57  ;;  %3170 = vmatprep.subr.bf16.mxu1 %v4496_v57 }
 0x7a6   :  { %3151 = vmatpush3.bf16.msra.mxu0 %v4177_v48  ;;  %3171 = vmatpush3.bf16.msra.mxu1 %v4180_v62 }
 0x7a7   :  { %3152 = vmatprep.subr.bf16.mxu0 %v4496_v57  ;;  %3172 = vmatprep.subr.bf16.mxu1 %v4496_v57 }
 0x7aa   :  { %3153 = vmatpush3.bf16.msra.mxu0 %v4185_v13  ;;  %3173 = vmatpush3.bf16.msra.mxu1 %v4188_v14 }
 0x7ab   :  { %3154 = vmatprep.subr.bf16.mxu0 %v4496_v57  ;;  %3174 = vmatprep.subr.bf16.mxu1 %v4496_v57 }
 0x7ae   :  { %3155 = vmatpush3.bf16.msra.mxu0 %v4193_v16  ;;  %3175 = vmatpush3.bf16.msra.mxu1 %v4196_v17 }
 0x7af   :  { %3156 = vmatprep.subr.bf16.mxu0 %v4496_v57  ;;  %3176 = vmatprep.subr.bf16.mxu1 %v4496_v57 }
 0x7b2   :  { %3157 = vmatpush3.bf16.msra.mxu0 %v4201_v18  ;;  %3177 = vmatpush3.bf16.msra.mxu1 %v4204_v19 }
 0x7b3   :  { %3182 = vmatprep.subr.bf16.mxu0 %v4496_v57 }
 0x7b5   :  { %3159 = vmatmul.mubr.bf16.vlgmr.msra.gmra.mxu0 %v1868_v63  ;;  %3179 = vmatmul.mubr.bf16.vlgmr.msra.gmra.mxu1 %v1868_v63 }
 0x7b6   :  { %3198 = vmatprep.mubr.msk.bf16.mxu0 %vm3515_vm2, %v4496_v57  ;;  %3183 = vmatpush3.bf16.msra.mxu0 %v3256_v3 }
 0x7b7   :  { %3184 = vmatprep.subr.bf16.mxu0 %v4496_v57 }
 0x7ba   :  { %3185 = vmatpush3.bf16.msra.mxu0 %v3257_v5 }
 0x7bb   :  { %3186 = vmatprep.subr.bf16.mxu0 %v4496_v57 }
 0x7be   :  { %3187 = vmatpush3.bf16.msra.mxu0 %v3258_v53 }
 0x7bf   :  { %3188 = vmatprep.subr.bf16.mxu0 %v4496_v57 }
 0x7c2   :  { %3189 = vmatpush3.bf16.msra.mxu0 %v3259_v45 }
 0x7c3   :  { %3190 = vmatprep.subr.bf16.mxu0 %v4496_v57 }
 0x7c6   :  { %3191 = vmatpush3.bf16.msra.mxu0 %v3260_v46 }
 0x7c7   :  { %3192 = vmatprep.subr.bf16.mxu0 %v4496_v57 }
 0x7ca   :  { %3193 = vmatpush3.bf16.msra.mxu0 %v3261_v51 }
 0x7cb   :  { %3194 = vmatprep.subr.bf16.mxu0 %v4496_v57 }
 0x7ce   :  { %3195 = vmatpush3.bf16.msra.mxu0 %v3262_v20 }
 0x7cf   :  { %3196 = vmatprep.subr.bf16.mxu0 %v4496_v57 }
 0x7d2   :  { %3197 = vmatpush3.bf16.msra.mxu0 %v3263_v56 }
 0x855   :  { %v1903_v48 = vpop.f32.mrf.mxu0  ;;  %v1944_v62 = vpop.f32.mrf.mxu1 }
 0x856   :  { %v1950_v59 = vadd.f32 %v1944_v62, %v4513_v52  ;;  %v1909_v12 = vadd.f32 %v1903_v48, %v4514_v34 }
 0x857   :  { %v3120_v13 = vpop.f32.mrf.mxu0  ;;  %v3140_v14 = vpop.f32.mrf.mxu1 }
 0x858   :  { %v2037_v54 = vmul.f32 0.5, %v1950_v59  ;;  %v2033_v30 = vmul.f32 0.5, %v1909_v12 }
 0x859   :  { %v1906_v16 = vpop.f32.mrf.mxu0  ;;  %v1947_v17 = vpop.f32.mrf.mxu1 }
 0x85a   :  { %3334 = vtanh.f32 %v2037_v54 }
 0x85b   :  { %v3121_v18 = vpop.f32.mrf.mxu0  ;;  %v3141_v19 = vpop.f32.mrf.mxu1  ;;  %3336 = vtanh.f32 %v2033_v30 }
 0x867   :  { %v3335_v40 = vpop.eup %3334 }
 0x868   :  { %v3337_v43 = vpop.eup %3336  ;;  %v2039_v44 = vmul.f32 0.5, %v3335_v40 }
 0x869   :  { %v2035_v1 = vmul.f32 0.5, %v3337_v43 }
 0x86a   :  { %v2040_v6 = vadd.f32 0.5, %v2039_v44 }
 0x86b   :  { %v2036_v21 = vadd.f32 0.5, %v2035_v1 }
 0x86c   :  { %v2046_v23 = vmul.f32 %v2040_v6, %v4410_v49 }
 0x875   :  { %v1985_v31 = vpop.f32.mrf.mxu0  ;;  %v2026_v57 = vpop.f32.mrf.mxu1 }
 0x876   :  { %v1991_v33 = vadd.f32 %v1985_v31, %v4515_v32  ;;  %v2032_v39 = vadd.f32 %v2026_v57, %v3856_v47 }
 0x877   :  { %v3160_v35 = vpop.f32.mrf.mxu0  ;;  %v3180_v36 = vpop.f32.mrf.mxu1 }
 0x878   :  { %3338 = vtanh.f32 %v1991_v33  ;;  %v2042_v29 = vmul.f32 0.5, %v2032_v39 }
 0x879   :  { %v1988_v37 = vpop.f32.mrf.mxu0  ;;  %v2029_v38 = vpop.f32.mrf.mxu1 }
 0x87a   :  { %3340 = vtanh.f32 %v2042_v29 }
 0x87b   :  { %v3161_v41 = vpop.f32.mrf.mxu0  ;;  %v3181_v42 = vpop.f32.mrf.mxu1 }
 0x885   :  { %v3339_v22 = vpop.eup %3338 }
 0x886   :  { %v2047_v24 = vmul.f32 %v3339_v22, %v2036_v21 }
 0x887   :  { %v3341_v27 = vpop.eup %3340 }
 0x888   :  { %v2048_v26 = vadd.f32 %v2047_v24, %v2046_v23  ;;  %v2044_v28 = vmul.f32 0.5, %v3341_v27 }
 0x88a   :  { %3342 = vtanh.f32 %v2048_v26  ;;  %v2045_v55 = vadd.f32 0.5, %v2044_v28 }
 0x897   :  { %v3343_v47 = vpop.eup %3342 }
 0x898   :  { %v2050_v2 = vmul.f32 %v3343_v47, %v2045_v55 }
 0x89a   :  { %v2056_v7 = vpack.c.bf16 %v2050_v2, %v2050_v2 }
 0x89c   :  { %3199 = vmatmul.mubr.bf16.vlgmr.msra.gmra.mxu0 %v2056_v7 }
 0x95c   :  { %v2162_v58 = vpop.f32.mrf.mxu0 }
 0x95d   :  { %v2163_v60 = vadd.f32 %v2236_v15, %v2162_v58 }
 0x95e   :  { %v3200_v11 = vpop.f32.mrf.mxu0 }
 0x95f   :  { %2168 = vst [vmem:[#allocation13] sm:$0xff] %v2163_v60 }
 0x960   :  { %v2165_v61 = vpop.f32.mrf.mxu0 }
 0x961   :  { %3487 = shalt.err (!%p3484_p1)
}
 0x962   :  { %2178 = dma.vmem_to_hbm [thread:$0]  %s2176_s24, 128, %s4474_s6, [#allocation6]   ;;  %v3201_v50 = vpop.f32.mrf.mxu0 }
 0x963   :  { %3502 = dma.done.wait [#allocation6], 128  }
 0x964   :  { %3503 = vsyncadd [#allocation6], 4294967168 }
 0x965   :  { %2182 = vsyncpa [#allocation5], 1 }
 0x966   :  { %2183 = vsyncpa [#allocation8], 1 }
 0x967   :  { %2184 = vsyncpa [#allocation11], 1 }
 0x968   :  { %2185 = vsyncpa [#allocation6], 1 }

</bundles_post_ra>
